<compile_context>
chip_gen: v7x
topology: tpu7x:2x2x1
jax: 0.10.0
libtpu: 0.0.40
codegen_flags: <defaults>
</compile_context>

<pallas_src>
import functools

import jax
import jax.numpy as jnp
from jax.experimental import pallas as pl
from jax.experimental.pallas import tpu as pltpu


def _sigmoid(x):
    return 1.0 / (1.0 + jnp.exp(-x))


def _lstm_kernel(x_ref, w_ih_ref, w_hh_ref, b_ref, h_out_ref, h_sc, c_sc,
                 *, chunk, batch, hidden):
    """One grid step = `chunk` consecutive timesteps.

    x_ref:     (chunk*B, nin)   timestep-major rows (row = t*B + b) for this chunk
    w_ih_ref:  (nin, 4H)        transposed input->gate weights (gate order i,f,g,o)
    w_hh_ref:  (H, 4H)          transposed hidden->gate weights
    b_ref:     (1, 4H)          b_ih + b_hh (folded)
    h_out_ref: (chunk*B, H)     hidden state for every timestep of the chunk
    h_sc,c_sc: (B, H)           recurrent state, persists across grid steps
    """
    B = batch
    H = hidden

    @pl.when(pl.program_id(0) == 0)
    def _():
        h_sc[...] = jnp.zeros_like(h_sc)
        c_sc[...] = jnp.zeros_like(c_sc)

    # Fused input projection for the whole chunk and all 4 gates: one MXU call,
    # lane-dense (4H = 384 is a multiple of 128).  Biases folded in.
    gx = jnp.dot(x_ref[...], w_ih_ref[...],
                 preferred_element_type=jnp.float32) + b_ref[...]

    h = h_sc[...]
    c = c_sc[...]
    w_hh = w_hh_ref[...]

    # Sequential recurrence over the chunk (static unroll; chunk is small, the
    # per-step h @ W_hh matmul is unavoidable serial work).
    for t in range(chunk):
        gates = gx[t * B:(t + 1) * B, :] + jnp.dot(
            h, w_hh, preferred_element_type=jnp.float32)
        i_g = _sigmoid(gates[:, 0 * H:1 * H])
        f_g = _sigmoid(gates[:, 1 * H:2 * H])
        g_g = jnp.tanh(gates[:, 2 * H:3 * H])
        o_g = _sigmoid(gates[:, 3 * H:4 * H])
        c = f_g * c + i_g * g_g
        h = o_g * jnp.tanh(c)
        h_out_ref[t * B:(t + 1) * B, :] = h

    h_sc[...] = h
    c_sc[...] = c


def rnn_forward(x_bct, w_ih, w_hh, b_ih, b_hh, *, chunk=8):
    """RNN module forward (single-layer unidirectional LSTM, zero init state).

    x_bct: (B, C, T) float32                      (module input, C == nin)
    w_ih:  (4H, nin)  w_hh: (4H, H)               (PyTorch nn.LSTM layout, i,f,g,o)
    b_ih, b_hh: (4H,)
    returns (B, H, T)                             (matches module.forward output)
    """
    B, C, T = x_bct.shape
    H4, nin = w_ih.shape
    H = H4 // 4
    assert nin == C and w_hh.shape == (H4, H) and b_ih.shape == (H4,)
    if T % chunk != 0:
        chunk = T  # tiny sequences: single chunk
    n_chunks = T // chunk

    # (B, C, T) -> (T, B, C) -> (T*B, C): timestep-major rows for the kernel.
    x_tb = jnp.transpose(x_bct, (2, 0, 1)).reshape(T * B, C).astype(jnp.float32)
    w_ih_t = jnp.transpose(w_ih).astype(jnp.float32)          # (nin, 4H)
    w_hh_t = jnp.transpose(w_hh).astype(jnp.float32)          # (H,   4H)
    b = (b_ih + b_hh).reshape(1, H4).astype(jnp.float32)      # folded bias

    kernel = functools.partial(_lstm_kernel, chunk=chunk, batch=B, hidden=H)

    h_tb = pl.pallas_call(
        kernel,
        out_shape=jax.ShapeDtypeStruct((T * B, H), jnp.float32),
        grid=(n_chunks,),
        in_specs=[
            pl.BlockSpec((chunk * B, C), lambda i: (i, 0)),   # x: tiled over time
            pl.BlockSpec((nin, H4), lambda i: (0, 0)),        # weights resident
            pl.BlockSpec((H, H4), lambda i: (0, 0)),
            pl.BlockSpec((1, H4), lambda i: (0, 0)),
        ],
        out_specs=pl.BlockSpec((chunk * B, H), lambda i: (i, 0)),
        scratch_shapes=[pltpu.VMEM((B, H), jnp.float32),      # h carry
                        pltpu.VMEM((B, H), jnp.float32)],     # c carry
        compiler_params=pltpu.CompilerParams(
            # Recurrent state carried in scratch across grid steps -> the time
            # axis must run sequentially on one core.
            dimension_semantics=("arbitrary",)),
    )(x_tb, w_ih_t, w_hh_t, b)

    # (T*B, H) -> (T, B, H) -> (B, H, T): the module's own final permute.
    return jnp.transpose(h_tb.reshape(T, B, H), (1, 2, 0))


def _reference(x_bct, w_ih, w_hh, b_ih, b_hh):
    """Pure-JAX reference reproducing nn.LSTM (1 layer, unidir) + permutes."""
    B, C, T = x_bct.shape
    H = w_hh.shape[1]
    x_tbc = jnp.transpose(x_bct, (2, 0, 1)).astype(jnp.float32)
    h = jnp.zeros((B, H), jnp.float32)
    c = jnp.zeros((B, H), jnp.float32)
    hp = jax.lax.Precision.HIGHEST
    outs = []
    for t in range(T):
        gates = (jnp.dot(x_tbc[t], w_ih.T, precision=hp) + b_ih
                 + jnp.dot(h, w_hh.T, precision=hp) + b_hh)
        i_g = _sigmoid(gates[:, 0 * H:1 * H])
        f_g = _sigmoid(gates[:, 1 * H:2 * H])
        g_g = jnp.tanh(gates[:, 2 * H:3 * H])
        o_g = _sigmoid(gates[:, 3 * H:4 * H])
        c = f_g * c + i_g * g_g
        h = o_g * jnp.tanh(c)
        outs.append(h)
    h_all = jnp.stack(outs, axis=0)              # (T, B, H)
    return jnp.transpose(h_all, (1, 2, 0))       # (B, H, T)


if __name__ == "__main__":
    key = jax.random.PRNGKey(0)
    kx, k1, k2, k3, k4 = jax.random.split(key, 5)

    # Module defaults nin=64, nout=96; small batch/sequence.
    B, nin, nout, T = 2, 64, 96, 16
    x = jax.random.normal(kx, (B, nin, T), jnp.float32)
    s = 1.0 / jnp.sqrt(jnp.float32(nout))        # PyTorch default init scale
    w_ih = s * jax.random.uniform(k1, (4 * nout, nin), jnp.float32, -1.0, 1.0)
    w_hh = s * jax.random.uniform(k2, (4 * nout, nout), jnp.float32, -1.0, 1.0)
    b_ih = s * jax.random.uniform(k3, (4 * nout,), jnp.float32, -1.0, 1.0)
    b_hh = s * jax.random.uniform(k4, (4 * nout,), jnp.float32, -1.0, 1.0)

    y = jax.jit(rnn_forward)(x, w_ih, w_hh, b_ih, b_hh)
    jax.block_until_ready(y)

    assert y.shape == (B, nout, T), y.shape
    y_ref = _reference(x, w_ih, w_hh, b_ih, b_hh)
    assert jnp.allclose(y, y_ref, atol=2e-3, rtol=2e-3), \
        float(jnp.max(jnp.abs(y - y_ref)))
    print("KERNEL_OK")
</pallas_src>

<mosaic_0001>
module attributes {stable_mosaic.version = 11 : i64} {
  func.func @_lstm_kernel(%arg0: i32, %arg1: memref<16x64xf32, #tpu.memory_space<vmem>>, %arg2: memref<64x384xf32, #tpu.memory_space<vmem>>, %arg3: memref<96x384xf32, #tpu.memory_space<vmem>>, %arg4: memref<1x384xf32, #tpu.memory_space<vmem>>, %arg5: memref<16x96xf32, #tpu.memory_space<vmem>>, %arg6: memref<2x96xf32, #tpu.memory_space<vmem>>, %arg7: memref<2x96xf32, #tpu.memory_space<vmem>>) attributes {dimension_semantics = [#tpu.dimension_semantics<arbitrary>], iteration_bounds = array<i64: 2>, scalar_prefetch = 0 : i64, scratch_operands = 2 : i64, tpu.core_type = #tpu.core_type<tc>, window_params = [{transform_indices = @transform_0, window_bounds = array<i64: 16, 64>}, {pipeline_mode = #tpu.pipeline_mode<synchronous>, transform_indices = @transform_1, window_bounds = array<i64: 64, 384>}, {pipeline_mode = #tpu.pipeline_mode<synchronous>, transform_indices = @transform_2, window_bounds = array<i64: 96, 384>}, {pipeline_mode = #tpu.pipeline_mode<synchronous>, transform_indices = @transform_3, window_bounds = array<i64: 1, 384>}, {transform_indices = @transform_4, window_bounds = array<i64: 16, 96>}]} {
    %c0_i32 = arith.constant 0 : i32
    %0 = arith.cmpi eq, %arg0, %c0_i32 : i32
    %1 = arith.extui %0 : i1 to i32
    %c0_i32_0 = arith.constant 0 : i32
    %2 = arith.cmpi ne, %1, %c0_i32_0 : i32
    scf.if %2 {
      %cst_105 = arith.constant 0.000000e+00 : f32
      %294 = vector.broadcast %cst_105 : f32 to vector<2x96xf32>
      %c0_106 = arith.constant 0 : index
      %c0_107 = arith.constant 0 : index
      %295 = vector.load %arg6[%c0_106, %c0_107] : memref<2x96xf32, #tpu.memory_space<vmem>>, vector<2x96xf32>
      tpu.vector_store %arg6[%c0_106, %c0_107], %294 {strides = array<i32>} : memref<2x96xf32, #tpu.memory_space<vmem>>, vector<2x96xf32>,
      %cst_108 = arith.constant 0.000000e+00 : f32
      %296 = vector.broadcast %cst_108 : f32 to vector<2x96xf32>
      %c0_109 = arith.constant 0 : index
      %c0_110 = arith.constant 0 : index
      %297 = vector.load %arg7[%c0_109, %c0_110] : memref<2x96xf32, #tpu.memory_space<vmem>>, vector<2x96xf32>
      tpu.vector_store %arg7[%c0_109, %c0_110], %296 {strides = array<i32>} : memref<2x96xf32, #tpu.memory_space<vmem>>, vector<2x96xf32>,
    } else {
    }
    %c0 = arith.constant 0 : index
    %c0_1 = arith.constant 0 : index
    %3 = vector.load %arg1[%c0, %c0_1] : memref<16x64xf32, #tpu.memory_space<vmem>>, vector<16x64xf32>
    %c0_2 = arith.constant 0 : index
    %c0_3 = arith.constant 0 : index
    %4 = vector.load %arg2[%c0_2, %c0_3] : memref<64x384xf32, #tpu.memory_space<vmem>>, vector<64x384xf32>
    %cst = arith.constant dense<0.000000e+00> : vector<16x384xf32>
    %5 = tpu.matmul %3, %4, %cst {dimension_numbers = #tpu.dot_dimension_numbers<[1], [0], [0], [1], [0, 0, 1, 1], [], []>} : vector<16x64xf32>, vector<64x384xf32>, vector<16x384xf32> -> vector<16x384xf32>
    %c0_4 = arith.constant 0 : index
    %c0_5 = arith.constant 0 : index
    %6 = vector.load %arg4[%c0_4, %c0_5] : memref<1x384xf32, #tpu.memory_space<vmem>>, vector<1x384xf32>
    %7 = vector.broadcast %6 : vector<1x384xf32> to vector<16x384xf32>
    %8 = arith.addf %5, %7 : vector<16x384xf32>
    %c0_6 = arith.constant 0 : index
    %c0_7 = arith.constant 0 : index
    %9 = vector.load %arg6[%c0_6, %c0_7] : memref<2x96xf32, #tpu.memory_space<vmem>>, vector<2x96xf32>
    %c0_8 = arith.constant 0 : index
    %c0_9 = arith.constant 0 : index
    %10 = vector.load %arg7[%c0_8, %c0_9] : memref<2x96xf32, #tpu.memory_space<vmem>>, vector<2x96xf32>
    %c0_10 = arith.constant 0 : index
    %c0_11 = arith.constant 0 : index
    %11 = vector.load %arg3[%c0_10, %c0_11] : memref<96x384xf32, #tpu.memory_space<vmem>>, vector<96x384xf32>
    %12 = vector.extract_strided_slice %8 {offsets = [0, 0], sizes = [2, 384], strides = [1, 1]} : vector<16x384xf32> to vector<2x384xf32>
    %cst_12 = arith.constant dense<0.000000e+00> : vector<2x384xf32>
    %13 = tpu.matmul %9, %11, %cst_12 {dimension_numbers = #tpu.dot_dimension_numbers<[1], [0], [0], [1], [0, 0, 1, 1], [], []>} : vector<2x96xf32>, vector<96x384xf32>, vector<2x384xf32> -> vector<2x384xf32>
    %14 = arith.addf %12, %13 : vector<2x384xf32>
    %15 = vector.extract_strided_slice %14 {offsets = [0, 0], sizes = [2, 96], strides = [1, 1]} : vector<2x384xf32> to vector<2x96xf32>
    %cst_13 = arith.constant 0.000000e+00 : f32
    %16 = vector.broadcast %cst_13 : f32 to vector<2x96xf32>
    %17 = arith.subf %16, %15 : vector<2x96xf32>
    %18 = math.exp %17 : vector<2x96xf32>
    %cst_14 = arith.constant 1.000000e+00 : f32
    %19 = vector.broadcast %cst_14 : f32 to vector<2x96xf32>
    %20 = arith.addf %19, %18 : vector<2x96xf32>
    %cst_15 = arith.constant 1.000000e+00 : f32
    %21 = vector.broadcast %cst_15 : f32 to vector<2x96xf32>
    %22 = arith.divf %21, %20 : vector<2x96xf32>
    %23 = vector.extract_strided_slice %14 {offsets = [0, 96], sizes = [2, 96], strides = [1, 1]} : vector<2x384xf32> to vector<2x96xf32>
    %cst_16 = arith.constant 0.000000e+00 : f32
    %24 = vector.broadcast %cst_16 : f32 to vector<2x96xf32>
    %25 = arith.subf %24, %23 : vector<2x96xf32>
    %26 = math.exp %25 : vector<2x96xf32>
    %cst_17 = arith.constant 1.000000e+00 : f32
    %27 = vector.broadcast %cst_17 : f32 to vector<2x96xf32>
    %28 = arith.addf %27, %26 : vector<2x96xf32>
    %cst_18 = arith.constant 1.000000e+00 : f32
    %29 = vector.broadcast %cst_18 : f32 to vector<2x96xf32>
    %30 = arith.divf %29, %28 : vector<2x96xf32>
    %31 = vector.extract_strided_slice %14 {offsets = [0, 192], sizes = [2, 96], strides = [1, 1]} : vector<2x384xf32> to vector<2x96xf32>
    %32 = math.tanh %31 : vector<2x96xf32>
    %33 = vector.extract_strided_slice %14 {offsets = [0, 288], sizes = [2, 96], strides = [1, 1]} : vector<2x384xf32> to vector<2x96xf32>
    %cst_19 = arith.constant 0.000000e+00 : f32
    %34 = vector.broadcast %cst_19 : f32 to vector<2x96xf32>
    %35 = arith.subf %34, %33 : vector<2x96xf32>
    %36 = math.exp %35 : vector<2x96xf32>
    %cst_20 = arith.constant 1.000000e+00 : f32
    %37 = vector.broadcast %cst_20 : f32 to vector<2x96xf32>
    %38 = arith.addf %37, %36 : vector<2x96xf32>
    %cst_21 = arith.constant 1.000000e+00 : f32
    %39 = vector.broadcast %cst_21 : f32 to vector<2x96xf32>
    %40 = arith.divf %39, %38 : vector<2x96xf32>
    %41 = arith.mulf %30, %10 : vector<2x96xf32>
    %42 = arith.mulf %22, %32 : vector<2x96xf32>
    %43 = arith.addf %41, %42 : vector<2x96xf32>
    %44 = math.tanh %43 : vector<2x96xf32>
    %45 = arith.mulf %40, %44 : vector<2x96xf32>
    %c0_22 = arith.constant 0 : index
    %c0_23 = arith.constant 0 : index
    %46 = vector.load %arg5[%c0_22, %c0_23] : memref<16x96xf32, #tpu.memory_space<vmem>>, vector<2x96xf32>
    tpu.vector_store %arg5[%c0_22, %c0_23], %45 {strides = array<i32>} : memref<16x96xf32, #tpu.memory_space<vmem>>, vector<2x96xf32>,
    %47 = vector.extract_strided_slice %8 {offsets = [2, 0], sizes = [2, 384], strides = [1, 1]} : vector<16x384xf32> to vector<2x384xf32>
    %cst_24 = arith.constant dense<0.000000e+00> : vector<2x384xf32>
    %48 = tpu.matmul %45, %11, %cst_24 {dimension_numbers = #tpu.dot_dimension_numbers<[1], [0], [0], [1], [0, 0, 1, 1], [], []>} : vector<2x96xf32>, vector<96x384xf32>, vector<2x384xf32> -> vector<2x384xf32>
    %49 = arith.addf %47, %48 : vector<2x384xf32>
    %50 = vector.extract_strided_slice %49 {offsets = [0, 0], sizes = [2, 96], strides = [1, 1]} : vector<2x384xf32> to vector<2x96xf32>
    %cst_25 = arith.constant 0.000000e+00 : f32
    %51 = vector.broadcast %cst_25 : f32 to vector<2x96xf32>
    %52 = arith.subf %51, %50 : vector<2x96xf32>
    %53 = math.exp %52 : vector<2x96xf32>
    %cst_26 = arith.constant 1.000000e+00 : f32
    %54 = vector.broadcast %cst_26 : f32 to vector<2x96xf32>
    %55 = arith.addf %54, %53 : vector<2x96xf32>
    %cst_27 = arith.constant 1.000000e+00 : f32
    %56 = vector.broadcast %cst_27 : f32 to vector<2x96xf32>
    %57 = arith.divf %56, %55 : vector<2x96xf32>
    %58 = vector.extract_strided_slice %49 {offsets = [0, 96], sizes = [2, 96], strides = [1, 1]} : vector<2x384xf32> to vector<2x96xf32>
    %cst_28 = arith.constant 0.000000e+00 : f32
    %59 = vector.broadcast %cst_28 : f32 to vector<2x96xf32>
    %60 = arith.subf %59, %58 : vector<2x96xf32>
    %61 = math.exp %60 : vector<2x96xf32>
    %cst_29 = arith.constant 1.000000e+00 : f32
    %62 = vector.broadcast %cst_29 : f32 to vector<2x96xf32>
    %63 = arith.addf %62, %61 : vector<2x96xf32>
    %cst_30 = arith.constant 1.000000e+00 : f32
    %64 = vector.broadcast %cst_30 : f32 to vector<2x96xf32>
    %65 = arith.divf %64, %63 : vector<2x96xf32>
    %66 = vector.extract_strided_slice %49 {offsets = [0, 192], sizes = [2, 96], strides = [1, 1]} : vector<2x384xf32> to vector<2x96xf32>
    %67 = math.tanh %66 : vector<2x96xf32>
    %68 = vector.extract_strided_slice %49 {offsets = [0, 288], sizes = [2, 96], strides = [1, 1]} : vector<2x384xf32> to vector<2x96xf32>
    %cst_31 = arith.constant 0.000000e+00 : f32
    %69 = vector.broadcast %cst_31 : f32 to vector<2x96xf32>
    %70 = arith.subf %69, %68 : vector<2x96xf32>
    %71 = math.exp %70 : vector<2x96xf32>
    %cst_32 = arith.constant 1.000000e+00 : f32
    %72 = vector.broadcast %cst_32 : f32 to vector<2x96xf32>
    %73 = arith.addf %72, %71 : vector<2x96xf32>
    %cst_33 = arith.constant 1.000000e+00 : f32
    %74 = vector.broadcast %cst_33 : f32 to vector<2x96xf32>
    %75 = arith.divf %74, %73 : vector<2x96xf32>
    %76 = arith.mulf %65, %43 : vector<2x96xf32>
    %77 = arith.mulf %57, %67 : vector<2x96xf32>
    %78 = arith.addf %76, %77 : vector<2x96xf32>
    %79 = math.tanh %78 : vector<2x96xf32>
    %80 = arith.mulf %75, %79 : vector<2x96xf32>
    %c2 = arith.constant 2 : index
    %c0_34 = arith.constant 0 : index
    %81 = vector.load %arg5[%c2, %c0_34] : memref<16x96xf32, #tpu.memory_space<vmem>>, vector<2x96xf32>
    tpu.vector_store %arg5[%c2, %c0_34], %80 {strides = array<i32>} : memref<16x96xf32, #tpu.memory_space<vmem>>, vector<2x96xf32>,
    %82 = vector.extract_strided_slice %8 {offsets = [4, 0], sizes = [2, 384], strides = [1, 1]} : vector<16x384xf32> to vector<2x384xf32>
    %cst_35 = arith.constant dense<0.000000e+00> : vector<2x384xf32>
    %83 = tpu.matmul %80, %11, %cst_35 {dimension_numbers = #tpu.dot_dimension_numbers<[1], [0], [0], [1], [0, 0, 1, 1], [], []>} : vector<2x96xf32>, vector<96x384xf32>, vector<2x384xf32> -> vector<2x384xf32>
    %84 = arith.addf %82, %83 : vector<2x384xf32>
    %85 = vector.extract_strided_slice %84 {offsets = [0, 0], sizes = [2, 96], strides = [1, 1]} : vector<2x384xf32> to vector<2x96xf32>
    %cst_36 = arith.constant 0.000000e+00 : f32
    %86 = vector.broadcast %cst_36 : f32 to vector<2x96xf32>
    %87 = arith.subf %86, %85 : vector<2x96xf32>
    %88 = math.exp %87 : vector<2x96xf32>
    %cst_37 = arith.constant 1.000000e+00 : f32
    %89 = vector.broadcast %cst_37 : f32 to vector<2x96xf32>
    %90 = arith.addf %89, %88 : vector<2x96xf32>
    %cst_38 = arith.constant 1.000000e+00 : f32
    %91 = vector.broadcast %cst_38 : f32 to vector<2x96xf32>
    %92 = arith.divf %91, %90 : vector<2x96xf32>
    %93 = vector.extract_strided_slice %84 {offsets = [0, 96], sizes = [2, 96], strides = [1, 1]} : vector<2x384xf32> to vector<2x96xf32>
    %cst_39 = arith.constant 0.000000e+00 : f32
    %94 = vector.broadcast %cst_39 : f32 to vector<2x96xf32>
    %95 = arith.subf %94, %93 : vector<2x96xf32>
    %96 = math.exp %95 : vector<2x96xf32>
    %cst_40 = arith.constant 1.000000e+00 : f32
    %97 = vector.broadcast %cst_40 : f32 to vector<2x96xf32>
    %98 = arith.addf %97, %96 : vector<2x96xf32>
    %cst_41 = arith.constant 1.000000e+00 : f32
    %99 = vector.broadcast %cst_41 : f32 to vector<2x96xf32>
    %100 = arith.divf %99, %98 : vector<2x96xf32>
    %101 = vector.extract_strided_slice %84 {offsets = [0, 192], sizes = [2, 96], strides = [1, 1]} : vector<2x384xf32> to vector<2x96xf32>
    %102 = math.tanh %101 : vector<2x96xf32>
    %103 = vector.extract_strided_slice %84 {offsets = [0, 288], sizes = [2, 96], strides = [1, 1]} : vector<2x384xf32> to vector<2x96xf32>
    %cst_42 = arith.constant 0.000000e+00 : f32
    %104 = vector.broadcast %cst_42 : f32 to vector<2x96xf32>
    %105 = arith.subf %104, %103 : vector<2x96xf32>
    %106 = math.exp %105 : vector<2x96xf32>
    %cst_43 = arith.constant 1.000000e+00 : f32
    %107 = vector.broadcast %cst_43 : f32 to vector<2x96xf32>
    %108 = arith.addf %107, %106 : vector<2x96xf32>
    %cst_44 = arith.constant 1.000000e+00 : f32
    %109 = vector.broadcast %cst_44 : f32 to vector<2x96xf32>
    %110 = arith.divf %109, %108 : vector<2x96xf32>
    %111 = arith.mulf %100, %78 : vector<2x96xf32>
    %112 = arith.mulf %92, %102 : vector<2x96xf32>
    %113 = arith.addf %111, %112 : vector<2x96xf32>
    %114 = math.tanh %113 : vector<2x96xf32>
    %115 = arith.mulf %110, %114 : vector<2x96xf32>
    %c4 = arith.constant 4 : index
    %c0_45 = arith.constant 0 : index
    %116 = vector.load %arg5[%c4, %c0_45] : memref<16x96xf32, #tpu.memory_space<vmem>>, vector<2x96xf32>
    tpu.vector_store %arg5[%c4, %c0_45], %115 {strides = array<i32>} : memref<16x96xf32, #tpu.memory_space<vmem>>, vector<2x96xf32>,
    %117 = vector.extract_strided_slice %8 {offsets = [6, 0], sizes = [2, 384], strides = [1, 1]} : vector<16x384xf32> to vector<2x384xf32>
    %cst_46 = arith.constant dense<0.000000e+00> : vector<2x384xf32>
    %118 = tpu.matmul %115, %11, %cst_46 {dimension_numbers = #tpu.dot_dimension_numbers<[1], [0], [0], [1], [0, 0, 1, 1], [], []>} : vector<2x96xf32>, vector<96x384xf32>, vector<2x384xf32> -> vector<2x384xf32>
    %119 = arith.addf %117, %118 : vector<2x384xf32>
    %120 = vector.extract_strided_slice %119 {offsets = [0, 0], sizes = [2, 96], strides = [1, 1]} : vector<2x384xf32> to vector<2x96xf32>
    %cst_47 = arith.constant 0.000000e+00 : f32
    %121 = vector.broadcast %cst_47 : f32 to vector<2x96xf32>
    %122 = arith.subf %121, %120 : vector<2x96xf32>
    %123 = math.exp %122 : vector<2x96xf32>
    %cst_48 = arith.constant 1.000000e+00 : f32
    %124 = vector.broadcast %cst_48 : f32 to vector<2x96xf32>
    %125 = arith.addf %124, %123 : vector<2x96xf32>
    %cst_49 = arith.constant 1.000000e+00 : f32
    %126 = vector.broadcast %cst_49 : f32 to vector<2x96xf32>
    %127 = arith.divf %126, %125 : vector<2x96xf32>
    %128 = vector.extract_strided_slice %119 {offsets = [0, 96], sizes = [2, 96], strides = [1, 1]} : vector<2x384xf32> to vector<2x96xf32>
    %cst_50 = arith.constant 0.000000e+00 : f32
    %129 = vector.broadcast %cst_50 : f32 to vector<2x96xf32>
    %130 = arith.subf %129, %128 : vector<2x96xf32>
    %131 = math.exp %130 : vector<2x96xf32>
    %cst_51 = arith.constant 1.000000e+00 : f32
    %132 = vector.broadcast %cst_51 : f32 to vector<2x96xf32>
    %133 = arith.addf %132, %131 : vector<2x96xf32>
    %cst_52 = arith.constant 1.000000e+00 : f32
    %134 = vector.broadcast %cst_52 : f32 to vector<2x96xf32>
    %135 = arith.divf %134, %133 : vector<2x96xf32>
    %136 = vector.extract_strided_slice %119 {offsets = [0, 192], sizes = [2, 96], strides = [1, 1]} : vector<2x384xf32> to vector<2x96xf32>
    %137 = math.tanh %136 : vector<2x96xf32>
    %138 = vector.extract_strided_slice %119 {offsets = [0, 288], sizes = [2, 96], strides = [1, 1]} : vector<2x384xf32> to vector<2x96xf32>
    %cst_53 = arith.constant 0.000000e+00 : f32
    %139 = vector.broadcast %cst_53 : f32 to vector<2x96xf32>
    %140 = arith.subf %139, %138 : vector<2x96xf32>
    %141 = math.exp %140 : vector<2x96xf32>
    %cst_54 = arith.constant 1.000000e+00 : f32
    %142 = vector.broadcast %cst_54 : f32 to vector<2x96xf32>
    %143 = arith.addf %142, %141 : vector<2x96xf32>
    %cst_55 = arith.constant 1.000000e+00 : f32
    %144 = vector.broadcast %cst_55 : f32 to vector<2x96xf32>
    %145 = arith.divf %144, %143 : vector<2x96xf32>
    %146 = arith.mulf %135, %113 : vector<2x96xf32>
    %147 = arith.mulf %127, %137 : vector<2x96xf32>
    %148 = arith.addf %146, %147 : vector<2x96xf32>
    %149 = math.tanh %148 : vector<2x96xf32>
    %150 = arith.mulf %145, %149 : vector<2x96xf32>
    %c6 = arith.constant 6 : index
    %c0_56 = arith.constant 0 : index
    %151 = vector.load %arg5[%c6, %c0_56] : memref<16x96xf32, #tpu.memory_space<vmem>>, vector<2x96xf32>
    tpu.vector_store %arg5[%c6, %c0_56], %150 {strides = array<i32>} : memref<16x96xf32, #tpu.memory_space<vmem>>, vector<2x96xf32>,
    %152 = vector.extract_strided_slice %8 {offsets = [8, 0], sizes = [2, 384], strides = [1, 1]} : vector<16x384xf32> to vector<2x384xf32>
    %cst_57 = arith.constant dense<0.000000e+00> : vector<2x384xf32>
    %153 = tpu.matmul %150, %11, %cst_57 {dimension_numbers = #tpu.dot_dimension_numbers<[1], [0], [0], [1], [0, 0, 1, 1], [], []>} : vector<2x96xf32>, vector<96x384xf32>, vector<2x384xf32> -> vector<2x384xf32>
    %154 = arith.addf %152, %153 : vector<2x384xf32>
    %155 = vector.extract_strided_slice %154 {offsets = [0, 0], sizes = [2, 96], strides = [1, 1]} : vector<2x384xf32> to vector<2x96xf32>
    %cst_58 = arith.constant 0.000000e+00 : f32
    %156 = vector.broadcast %cst_58 : f32 to vector<2x96xf32>
    %157 = arith.subf %156, %155 : vector<2x96xf32>
    %158 = math.exp %157 : vector<2x96xf32>
    %cst_59 = arith.constant 1.000000e+00 : f32
    %159 = vector.broadcast %cst_59 : f32 to vector<2x96xf32>
    %160 = arith.addf %159, %158 : vector<2x96xf32>
    %cst_60 = arith.constant 1.000000e+00 : f32
    %161 = vector.broadcast %cst_60 : f32 to vector<2x96xf32>
    %162 = arith.divf %161, %160 : vector<2x96xf32>
    %163 = vector.extract_strided_slice %154 {offsets = [0, 96], sizes = [2, 96], strides = [1, 1]} : vector<2x384xf32> to vector<2x96xf32>
    %cst_61 = arith.constant 0.000000e+00 : f32
    %164 = vector.broadcast %cst_61 : f32 to vector<2x96xf32>
    %165 = arith.subf %164, %163 : vector<2x96xf32>
    %166 = math.exp %165 : vector<2x96xf32>
    %cst_62 = arith.constant 1.000000e+00 : f32
    %167 = vector.broadcast %cst_62 : f32 to vector<2x96xf32>
    %168 = arith.addf %167, %166 : vector<2x96xf32>
    %cst_63 = arith.constant 1.000000e+00 : f32
    %169 = vector.broadcast %cst_63 : f32 to vector<2x96xf32>
    %170 = arith.divf %169, %168 : vector<2x96xf32>
    %171 = vector.extract_strided_slice %154 {offsets = [0, 192], sizes = [2, 96], strides = [1, 1]} : vector<2x384xf32> to vector<2x96xf32>
    %172 = math.tanh %171 : vector<2x96xf32>
    %173 = vector.extract_strided_slice %154 {offsets = [0, 288], sizes = [2, 96], strides = [1, 1]} : vector<2x384xf32> to vector<2x96xf32>
    %cst_64 = arith.constant 0.000000e+00 : f32
    %174 = vector.broadcast %cst_64 : f32 to vector<2x96xf32>
    %175 = arith.subf %174, %173 : vector<2x96xf32>
    %176 = math.exp %175 : vector<2x96xf32>
    %cst_65 = arith.constant 1.000000e+00 : f32
    %177 = vector.broadcast %cst_65 : f32 to vector<2x96xf32>
    %178 = arith.addf %177, %176 : vector<2x96xf32>
    %cst_66 = arith.constant 1.000000e+00 : f32
    %179 = vector.broadcast %cst_66 : f32 to vector<2x96xf32>
    %180 = arith.divf %179, %178 : vector<2x96xf32>
    %181 = arith.mulf %170, %148 : vector<2x96xf32>
    %182 = arith.mulf %162, %172 : vector<2x96xf32>
    %183 = arith.addf %181, %182 : vector<2x96xf32>
    %184 = math.tanh %183 : vector<2x96xf32>
    %185 = arith.mulf %180, %184 : vector<2x96xf32>
    %c8 = arith.constant 8 : index
    %c0_67 = arith.constant 0 : index
    %186 = vector.load %arg5[%c8, %c0_67] : memref<16x96xf32, #tpu.memory_space<vmem>>, vector<2x96xf32>
    tpu.vector_store %arg5[%c8, %c0_67], %185 {strides = array<i32>} : memref<16x96xf32, #tpu.memory_space<vmem>>, vector<2x96xf32>,
    %187 = vector.extract_strided_slice %8 {offsets = [10, 0], sizes = [2, 384], strides = [1, 1]} : vector<16x384xf32> to vector<2x384xf32>
    %cst_68 = arith.constant dense<0.000000e+00> : vector<2x384xf32>
    %188 = tpu.matmul %185, %11, %cst_68 {dimension_numbers = #tpu.dot_dimension_numbers<[1], [0], [0], [1], [0, 0, 1, 1], [], []>} : vector<2x96xf32>, vector<96x384xf32>, vector<2x384xf32> -> vector<2x384xf32>
    %189 = arith.addf %187, %188 : vector<2x384xf32>
    %190 = vector.extract_strided_slice %189 {offsets = [0, 0], sizes = [2, 96], strides = [1, 1]} : vector<2x384xf32> to vector<2x96xf32>
    %cst_69 = arith.constant 0.000000e+00 : f32
    %191 = vector.broadcast %cst_69 : f32 to vector<2x96xf32>
    %192 = arith.subf %191, %190 : vector<2x96xf32>
    %193 = math.exp %192 : vector<2x96xf32>
    %cst_70 = arith.constant 1.000000e+00 : f32
    %194 = vector.broadcast %cst_70 : f32 to vector<2x96xf32>
    %195 = arith.addf %194, %193 : vector<2x96xf32>
    %cst_71 = arith.constant 1.000000e+00 : f32
    %196 = vector.broadcast %cst_71 : f32 to vector<2x96xf32>
    %197 = arith.divf %196, %195 : vector<2x96xf32>
    %198 = vector.extract_strided_slice %189 {offsets = [0, 96], sizes = [2, 96], strides = [1, 1]} : vector<2x384xf32> to vector<2x96xf32>
    %cst_72 = arith.constant 0.000000e+00 : f32
    %199 = vector.broadcast %cst_72 : f32 to vector<2x96xf32>
    %200 = arith.subf %199, %198 : vector<2x96xf32>
    %201 = math.exp %200 : vector<2x96xf32>
    %cst_73 = arith.constant 1.000000e+00 : f32
    %202 = vector.broadcast %cst_73 : f32 to vector<2x96xf32>
    %203 = arith.addf %202, %201 : vector<2x96xf32>
    %cst_74 = arith.constant 1.000000e+00 : f32
    %204 = vector.broadcast %cst_74 : f32 to vector<2x96xf32>
    %205 = arith.divf %204, %203 : vector<2x96xf32>
    %206 = vector.extract_strided_slice %189 {offsets = [0, 192], sizes = [2, 96], strides = [1, 1]} : vector<2x384xf32> to vector<2x96xf32>
    %207 = math.tanh %206 : vector<2x96xf32>
    %208 = vector.extract_strided_slice %189 {offsets = [0, 288], sizes = [2, 96], strides = [1, 1]} : vector<2x384xf32> to vector<2x96xf32>
    %cst_75 = arith.constant 0.000000e+00 : f32
    %209 = vector.broadcast %cst_75 : f32 to vector<2x96xf32>
    %210 = arith.subf %209, %208 : vector<2x96xf32>
    %211 = math.exp %210 : vector<2x96xf32>
    %cst_76 = arith.constant 1.000000e+00 : f32
    %212 = vector.broadcast %cst_76 : f32 to vector<2x96xf32>
    %213 = arith.addf %212, %211 : vector<2x96xf32>
    %cst_77 = arith.constant 1.000000e+00 : f32
    %214 = vector.broadcast %cst_77 : f32 to vector<2x96xf32>
    %215 = arith.divf %214, %213 : vector<2x96xf32>
    %216 = arith.mulf %205, %183 : vector<2x96xf32>
    %217 = arith.mulf %197, %207 : vector<2x96xf32>
    %218 = arith.addf %216, %217 : vector<2x96xf32>
    %219 = math.tanh %218 : vector<2x96xf32>
    %220 = arith.mulf %215, %219 : vector<2x96xf32>
    %c10 = arith.constant 10 : index
    %c0_78 = arith.constant 0 : index
    %221 = vector.load %arg5[%c10, %c0_78] : memref<16x96xf32, #tpu.memory_space<vmem>>, vector<2x96xf32>
    tpu.vector_store %arg5[%c10, %c0_78], %220 {strides = array<i32>} : memref<16x96xf32, #tpu.memory_space<vmem>>, vector<2x96xf32>,
    %222 = vector.extract_strided_slice %8 {offsets = [12, 0], sizes = [2, 384], strides = [1, 1]} : vector<16x384xf32> to vector<2x384xf32>
    %cst_79 = arith.constant dense<0.000000e+00> : vector<2x384xf32>
    %223 = tpu.matmul %220, %11, %cst_79 {dimension_numbers = #tpu.dot_dimension_numbers<[1], [0], [0], [1], [0, 0, 1, 1], [], []>} : vector<2x96xf32>, vector<96x384xf32>, vector<2x384xf32> -> vector<2x384xf32>
    %224 = arith.addf %222, %223 : vector<2x384xf32>
    %225 = vector.extract_strided_slice %224 {offsets = [0, 0], sizes = [2, 96], strides = [1, 1]} : vector<2x384xf32> to vector<2x96xf32>
    %cst_80 = arith.constant 0.000000e+00 : f32
    %226 = vector.broadcast %cst_80 : f32 to vector<2x96xf32>
    %227 = arith.subf %226, %225 : vector<2x96xf32>
    %228 = math.exp %227 : vector<2x96xf32>
    %cst_81 = arith.constant 1.000000e+00 : f32
    %229 = vector.broadcast %cst_81 : f32 to vector<2x96xf32>
    %230 = arith.addf %229, %228 : vector<2x96xf32>
    %cst_82 = arith.constant 1.000000e+00 : f32
    %231 = vector.broadcast %cst_82 : f32 to vector<2x96xf32>
    %232 = arith.divf %231, %230 : vector<2x96xf32>
    %233 = vector.extract_strided_slice %224 {offsets = [0, 96], sizes = [2, 96], strides = [1, 1]} : vector<2x384xf32> to vector<2x96xf32>
    %cst_83 = arith.constant 0.000000e+00 : f32
    %234 = vector.broadcast %cst_83 : f32 to vector<2x96xf32>
    %235 = arith.subf %234, %233 : vector<2x96xf32>
    %236 = math.exp %235 : vector<2x96xf32>
    %cst_84 = arith.constant 1.000000e+00 : f32
    %237 = vector.broadcast %cst_84 : f32 to vector<2x96xf32>
    %238 = arith.addf %237, %236 : vector<2x96xf32>
    %cst_85 = arith.constant 1.000000e+00 : f32
    %239 = vector.broadcast %cst_85 : f32 to vector<2x96xf32>
    %240 = arith.divf %239, %238 : vector<2x96xf32>
    %241 = vector.extract_strided_slice %224 {offsets = [0, 192], sizes = [2, 96], strides = [1, 1]} : vector<2x384xf32> to vector<2x96xf32>
    %242 = math.tanh %241 : vector<2x96xf32>
    %243 = vector.extract_strided_slice %224 {offsets = [0, 288], sizes = [2, 96], strides = [1, 1]} : vector<2x384xf32> to vector<2x96xf32>
    %cst_86 = arith.constant 0.000000e+00 : f32
    %244 = vector.broadcast %cst_86 : f32 to vector<2x96xf32>
    %245 = arith.subf %244, %243 : vector<2x96xf32>
    %246 = math.exp %245 : vector<2x96xf32>
    %cst_87 = arith.constant 1.000000e+00 : f32
    %247 = vector.broadcast %cst_87 : f32 to vector<2x96xf32>
    %248 = arith.addf %247, %246 : vector<2x96xf32>
    %cst_88 = arith.constant 1.000000e+00 : f32
    %249 = vector.broadcast %cst_88 : f32 to vector<2x96xf32>
    %250 = arith.divf %249, %248 : vector<2x96xf32>
    %251 = arith.mulf %240, %218 : vector<2x96xf32>
    %252 = arith.mulf %232, %242 : vector<2x96xf32>
    %253 = arith.addf %251, %252 : vector<2x96xf32>
    %254 = math.tanh %253 : vector<2x96xf32>
    %255 = arith.mulf %250, %254 : vector<2x96xf32>
    %c12 = arith.constant 12 : index
    %c0_89 = arith.constant 0 : index
    %256 = vector.load %arg5[%c12, %c0_89] : memref<16x96xf32, #tpu.memory_space<vmem>>, vector<2x96xf32>
    tpu.vector_store %arg5[%c12, %c0_89], %255 {strides = array<i32>} : memref<16x96xf32, #tpu.memory_space<vmem>>, vector<2x96xf32>,
    %257 = vector.extract_strided_slice %8 {offsets = [14, 0], sizes = [2, 384], strides = [1, 1]} : vector<16x384xf32> to vector<2x384xf32>
    %cst_90 = arith.constant dense<0.000000e+00> : vector<2x384xf32>
    %258 = tpu.matmul %255, %11, %cst_90 {dimension_numbers = #tpu.dot_dimension_numbers<[1], [0], [0], [1], [0, 0, 1, 1], [], []>} : vector<2x96xf32>, vector<96x384xf32>, vector<2x384xf32> -> vector<2x384xf32>
    %259 = arith.addf %257, %258 : vector<2x384xf32>
    %260 = vector.extract_strided_slice %259 {offsets = [0, 0], sizes = [2, 96], strides = [1, 1]} : vector<2x384xf32> to vector<2x96xf32>
    %cst_91 = arith.constant 0.000000e+00 : f32
    %261 = vector.broadcast %cst_91 : f32 to vector<2x96xf32>
    %262 = arith.subf %261, %260 : vector<2x96xf32>
    %263 = math.exp %262 : vector<2x96xf32>
    %cst_92 = arith.constant 1.000000e+00 : f32
    %264 = vector.broadcast %cst_92 : f32 to vector<2x96xf32>
    %265 = arith.addf %264, %263 : vector<2x96xf32>
    %cst_93 = arith.constant 1.000000e+00 : f32
    %266 = vector.broadcast %cst_93 : f32 to vector<2x96xf32>
    %267 = arith.divf %266, %265 : vector<2x96xf32>
    %268 = vector.extract_strided_slice %259 {offsets = [0, 96], sizes = [2, 96], strides = [1, 1]} : vector<2x384xf32> to vector<2x96xf32>
    %cst_94 = arith.constant 0.000000e+00 : f32
    %269 = vector.broadcast %cst_94 : f32 to vector<2x96xf32>
    %270 = arith.subf %269, %268 : vector<2x96xf32>
    %271 = math.exp %270 : vector<2x96xf32>
    %cst_95 = arith.constant 1.000000e+00 : f32
    %272 = vector.broadcast %cst_95 : f32 to vector<2x96xf32>
    %273 = arith.addf %272, %271 : vector<2x96xf32>
    %cst_96 = arith.constant 1.000000e+00 : f32
    %274 = vector.broadcast %cst_96 : f32 to vector<2x96xf32>
    %275 = arith.divf %274, %273 : vector<2x96xf32>
    %276 = vector.extract_strided_slice %259 {offsets = [0, 192], sizes = [2, 96], strides = [1, 1]} : vector<2x384xf32> to vector<2x96xf32>
    %277 = math.tanh %276 : vector<2x96xf32>
    %278 = vector.extract_strided_slice %259 {offsets = [0, 288], sizes = [2, 96], strides = [1, 1]} : vector<2x384xf32> to vector<2x96xf32>
    %cst_97 = arith.constant 0.000000e+00 : f32
    %279 = vector.broadcast %cst_97 : f32 to vector<2x96xf32>
    %280 = arith.subf %279, %278 : vector<2x96xf32>
    %281 = math.exp %280 : vector<2x96xf32>
    %cst_98 = arith.constant 1.000000e+00 : f32
    %282 = vector.broadcast %cst_98 : f32 to vector<2x96xf32>
    %283 = arith.addf %282, %281 : vector<2x96xf32>
    %cst_99 = arith.constant 1.000000e+00 : f32
    %284 = vector.broadcast %cst_99 : f32 to vector<2x96xf32>
    %285 = arith.divf %284, %283 : vector<2x96xf32>
    %286 = arith.mulf %275, %253 : vector<2x96xf32>
    %287 = arith.mulf %267, %277 : vector<2x96xf32>
    %288 = arith.addf %286, %287 : vector<2x96xf32>
    %289 = math.tanh %288 : vector<2x96xf32>
    %290 = arith.mulf %285, %289 : vector<2x96xf32>
    %c14 = arith.constant 14 : index
    %c0_100 = arith.constant 0 : index
    %291 = vector.load %arg5[%c14, %c0_100] : memref<16x96xf32, #tpu.memory_space<vmem>>, vector<2x96xf32>
    tpu.vector_store %arg5[%c14, %c0_100], %290 {strides = array<i32>} : memref<16x96xf32, #tpu.memory_space<vmem>>, vector<2x96xf32>,
    %c0_101 = arith.constant 0 : index
    %c0_102 = arith.constant 0 : index
    %292 = vector.load %arg6[%c0_101, %c0_102] : memref<2x96xf32, #tpu.memory_space<vmem>>, vector<2x96xf32>
    tpu.vector_store %arg6[%c0_101, %c0_102], %290 {strides = array<i32>} : memref<2x96xf32, #tpu.memory_space<vmem>>, vector<2x96xf32>,
    %c0_103 = arith.constant 0 : index
    %c0_104 = arith.constant 0 : index
    %293 = vector.load %arg7[%c0_103, %c0_104] : memref<2x96xf32, #tpu.memory_space<vmem>>, vector<2x96xf32>
    tpu.vector_store %arg7[%c0_103, %c0_104], %288 {strides = array<i32>} : memref<2x96xf32, #tpu.memory_space<vmem>>, vector<2x96xf32>,
    return
  }
  func.func @transform_0(%arg0: i32) -> (i32, i32) {
    %c0_i32 = arith.constant 0 : i32
    %c0_i32_0 = arith.constant 0 : i32
    return %arg0, %c0_i32 : i32, i32
  }
  func.func @transform_1(%arg0: i32) -> (i32, i32) {
    %c0_i32 = arith.constant 0 : i32
    %c0_i32_0 = arith.constant 0 : i32
    %c0_i32_1 = arith.constant 0 : i32
    return %c0_i32, %c0_i32_0 : i32, i32
  }
  func.func @transform_2(%arg0: i32) -> (i32, i32) {
    %c0_i32 = arith.constant 0 : i32
    %c0_i32_0 = arith.constant 0 : i32
    %c0_i32_1 = arith.constant 0 : i32
    return %c0_i32, %c0_i32_0 : i32, i32
  }
  func.func @transform_3(%arg0: i32) -> (i32, i32) {
    %c0_i32 = arith.constant 0 : i32
    %c0_i32_0 = arith.constant 0 : i32
    %c0_i32_1 = arith.constant 0 : i32
    return %c0_i32, %c0_i32_0 : i32, i32
  }
  func.func @transform_4(%arg0: i32) -> (i32, i32) {
    %c0_i32 = arith.constant 0 : i32
    %c0_i32_0 = arith.constant 0 : i32
    return %arg0, %c0_i32 : i32, i32
  }
}

</mosaic_0001>

<bundles_post_ra>
// kernel: rnn_forward.1
= control target key start
LH: loop header
LB: loop body
LE: loop exit
PB: predicated region body
PF: predicated region fallthrough
CT: control target
= control target key end

     0   :  { %9 = vsyncpa [#allocation5], 0  ;;  %s3905_s0 = inlined_call_operand.vmem [shape: f32[32,64], index: 0, kind: input, shape index: {}]   ;;  %s3906_s1 = inlined_call_operand.hbm [shape: f32[64,384], index: 1, kind: input, shape index: {}]   ;;  %s3907_s2 = inlined_call_operand.hbm [shape: f32[96,384], index: 2, kind: input, shape index: {}]   ;;  %s3908_s3 = inlined_call_operand.vmem [shape: f32[1,384], index: 3, kind: input, shape index: {}]   ;;  %s3909_s4 = inlined_call_operand.vmem [shape: f32[32,96], index: 4, kind: output, shape index: {}]  }
   0x1   :  { %10 = vsyncpa [#allocation7], 0  ;;  %s3339_s15 = smov 0  }
   0x2 LB: > { %s3345_s16 = sadd.s32 4294967295, %s3301_s15   ;;  %p2282_p0 = scmp.ge.s32.totalorder %s3301_s15, 1  ;;  %s3301_s15 = sphi %s3339_s15, %s16_s15  }
   0x3   : > { %p136_p1 = scmp.lt.s32.totalorder %s3301_s15, 3  ;;  %s3303_s17 = smov [#allocation4]  }
   0x4   : > { %s148_s18 = sshll.u32 %s3303_s17, 4  ;;  %p3910_p4 = scmp.eq.s32.totalorder %s3345_s16, 0  ;;  %s149_s18 = int_to_ptr.vmem [resolvable:$true] %s148_s18 }
   0x5   : > { %p3350_p3 = pnand %p2282_p0, %p136_p1  ;;  %s3304_s20 = smov [#allocation6]  }
   0x6   : > { %s161_s21 = sshll.u32 %s3304_s20, 4  ;;  %s3231_s25 = scalar_lea.hbm %s3906_s1, 3072  ;;  %s3363_s21 = int_to_ptr.vmem [resolvable:$true] %s161_s21 }
   0x7   : > { %s3912_s19 = scalar_select %p3350_p3, 1, 0 }
   0x8   : > { %p3041_p5 = pneg %p3350_p3  ;;  %p3232_p7 = scmp.ne.s32.totalorder %s3906_s1, %s3231_s25 }
   0x9   : > { %p3238_p11 = scmp.lt.u32.totalorder %s3231_s25, %s3906_s1 }
   0xa   : > { %p3359_p6 = pnand %p3910_p4, %p3041_p5 }
   0xc   : > { %p3233_p8 = pneg %p3359_p6 }
   0xe   : > { %p3234_p9 = pnand %p3233_p8, %p3232_p7 }
  0x10   : > { %p3235_p10 = pneg %p3234_p9 }
  0x12   : > { %p3240_p12 = pnand %p3238_p11, %p3235_p10 }
  0x14   : > { %3243 = shalt.err (!%p3240_p12)
}
  0x15   : > { %s3244_s30 = scalar_lea.vmem %s149_s18, 3072  ;;  %p3252_p5 = scmp.lt.s32.totalorder %s149_s18, %s149_s18 }
  0x16   : > { %p3245_p13 = scmp.ne.s32.totalorder %s149_s18, %s3244_s30  ;;  %p3253_p2 = scmp.lt.s32.totalorder %s3244_s30, %s3244_s30 }
  0x18   : > { %p3247_p0 = pnand %p3245_p13, %p3233_p8  ;;  %p3254_p4 = por %p3253_p2, %p3252_p5 }
  0x1a   : > { %p3248_p1 = pneg %p3247_p0 }
  0x1c   : > { %p3255_p3 = pnand %p3254_p4, %p3248_p1 }
  0x1e   : > { %3258 = shalt.err (!%p3255_p3)
}
  0x1f   : > { %s3305_s5 = smov 384   ;;  %s3306_s6 = smov 24  }
  0x20   : > { %3044 = dma.hbm_to_vmem [thread:$0]  (!%p3359_p6), %s3906_s1, 3072, %s149_s18, [#allocation5], %s3305_s5, %s3305_s5, %s3306_s6  }
  0x21   : > { %s3259_s11 = scalar_lea.hbm %s3907_s2, 4608 }
  0x22   : > { %p3260_p7 = scmp.ne.s32.totalorder %s3907_s2, %s3259_s11  ;;  %p3266_p4 = scmp.lt.u32.totalorder %s3259_s11, %s3907_s2 }
  0x24   : > { %p3262_p2 = pnand %p3260_p7, %p3233_p8 }
  0x26   : > { %p3263_p3 = pneg %p3262_p2 }
  0x28   : > { %p3268_p9 = pnand %p3266_p4, %p3263_p3 }
  0x2a   : > { %3271 = shalt.err (!%p3268_p9)
}
  0x2b   : > { %s3272_s18 = scalar_lea.vmem %s3363_s21, 4608  ;;  %p3280_p13 = scmp.lt.s32.totalorder %s3363_s21, %s3363_s21 }
  0x2c   : > { %p3273_p10 = scmp.ne.s32.totalorder %s3363_s21, %s3272_s18  ;;  %p3281_p0 = scmp.lt.s32.totalorder %s3272_s18, %s3272_s18 }
  0x2e   : > { %p3275_p11 = pnand %p3273_p10, %p3233_p8  ;;  %p3282_p1 = por %p3281_p0, %p3280_p13 }
  0x30   : > { %p3276_p12 = pneg %p3275_p11 }
  0x32   : > { %p3283_p5 = pnand %p3282_p1, %p3276_p12 }
  0x34   : > { %3286 = shalt.err (!%p3283_p5)
}
  0x35   : > { %3047 = dma.hbm_to_vmem [thread:$0]  (!%p3359_p6), %s3907_s2, 4608, %s3363_s21, [#allocation7], %s3305_s5, %s3305_s5, %s3306_s6  }
  0x36   : > { %p3914_p7 = scmp.ne.s32.totalorder %s3912_s19, 0 }
  0x37   : > { %p3915_p2 = scmp.eq.s32.totalorder (!%p3914_p7), %s3345_s16, 0 }
  0x38   : > { %189 = sbr.rel (%p3914_p7) target bundleno = 5794 (0x16a2), region = 36 }
  0x3f   : > { %3292 = dma.done.wait (%p3915_p2), [#allocation5], 3072   ;;  %p3916_p8 = pmov %p3915_p2 }
  0x40   : > { %p3917_p3 = pmov %p3915_p2 }
  0x41   : > { %3294 = vsyncadd (%p3916_p8), [#allocation5], 4294964224 }
  0x42   : > { %3296 = dma.done.wait (%p3917_p3), [#allocation7], 4608   ;;  %p3918_p4 = pmov %p3915_p2 }
  0x43   : > { %s2289_s22 = sshll.u32 %s3345_s16, 1  ;;  %p3919_p6 = scmp.ne.s32.totalorder %s3345_s16, 0 }
  0x44   : > { %3298 = vsyncadd (%p3918_p4), [#allocation7], 4294962688  ;;  %p220_p9 = scmp.lt.s32.totalorder %s2289_s22, 3  ;;  %vm235_vm0 = vcmask (!%p3919_p6), 779264   ;;  %v3307_v0 = vmov (!%p3919_p6), 0.0  }
  0x45   : > { %234 = sbr.rel (%p3919_p6) target bundleno = 76 (0x4c), region = 48  ;;  %236 = vst.msk [vmem:[#allocation2] sm:$0x3] (!%p3919_p6), %vm235_vm0, %v3307_v0  ;;  %237 = vst.msk [vmem:[#allocation3] sm:$0x3] (!%p3919_p6), %vm235_vm0, %v3307_v0 }
  0x46   : > { %s3921_s22 = smov (!%p220_p9, %s2289_s22), 3 }
  0x47   : > { %s2290_s21 = sshll.u32 %s3921_s22, 3 }
  0x48   : > { %s3426_s25 = scalar_lea.vmem %s3905_s0, %s2290_s21  ;;  %s3431_s28 = scalar_lea.vmem %s3909_s4, %s2290_s21 }
  0x4c PF: > { %v241_v1 = vld [vmem:[#allocation4 + $0x8] sm:$0xff]  ;;  %v244_v2 = vld [vmem:[#allocation4 + $0x20] sm:$0xff]  ;;  %v242_v3 = vld [vmem:[#allocation4 + $0x10] sm:$0xff]  ;;  %v3308_v8 = vmov 0.0   ;;  %vm281_vm1 = vcmask 523264   ;;  %v3309_v55 = vmov 0.0|0.0  }
  0x4d   : > { %v2665_v4 = vpack.c.bf16 %v244_v2, %v241_v1  ;;  %v245_v5 = vld [vmem:[#allocation4 + $0x28] sm:$0xff]  ;;  %v240_v6 = vld [vmem:[#allocation4] sm:$0xff]  ;;  %v243_v7 = vld [vmem:[#allocation4 + $0x18] sm:$0xff]  ;;  %352 = vmatprep.mubr.f32.mxu0 %v3308_v8  ;;  %vm3310_vm2 = vmmov 0   ;;  %s3311_s16 = smov 96   ;;  %vm478_vm3 = vcmask 785408  }
  0x4e   : > { %v2681_v9 = vpack.c.bf16 %v245_v5, %v242_v3  ;;  %v2667_v10 = vpack.c.bf16 %v243_v7, %v240_v6  ;;  %v247_v11 = vld [vmem:[#allocation4 + $0x38] sm:$0xff]  ;;  %v250_v12 = vld [vmem:[#allocation4 + $0x50] sm:$0xff]  ;;  %v248_v13 = vld [vmem:[#allocation4 + $0x40] sm:$0xff]  ;;  %s3312_s5 = smov 64   ;;  %vm682_vm4 = vcmask 779264   ;;  %s3313_s6 = smov 32  }
  0x4f   : > { %2666 = vmatprep.subr.bf16.mxu0 %v2665_v4  ;;  %v2669_v14 = vpack.c.bf16 %v250_v12, %v247_v11  ;;  %v251_v15 = vld [vmem:[#allocation4 + $0x58] sm:$0xff]  ;;  %v246_v16 = vld [vmem:[#allocation4 + $0x30] sm:$0xff]  ;;  %v249_v17 = vld [vmem:[#allocation4 + $0x48] sm:$0xff]  ;;  %vm897_vm5 = vcmask 781314   ;;  %vm1115_vm6 = vcmask 783364   ;;  %vm1333_vm7 = vcmask 785414  }
  0x50   : > { %2682 = vmatprep.subr.bf16.mxu1 %v2681_v9  ;;  %2668 = vmatpush1.bf16.msra.mxu0 %v2667_v10  ;;  %v2685_v18 = vpack.c.bf16 %v251_v15, %v248_v13  ;;  %v2671_v19 = vpack.c.bf16 %v249_v17, %v246_v16  ;;  %v253_v20 = vld [vmem:[#allocation4 + $0x68] sm:$0xff]  ;;  %v256_v21 = vld [vmem:[#allocation4 + $0x80] sm:$0xff]  ;;  %v254_v22 = vld [vmem:[#allocation4 + $0x70] sm:$0xff]  ;;  %vm2198_vm8 = vcmask 261120  }
  0x51   : > { %2684 = vmatpush3.bf16.msra.mxu1 %v2681_v9  ;;  %2670 = vmatprep.subr.bf16.mxu0 %v2669_v14  ;;  %v2673_v23 = vpack.c.bf16 %v256_v21, %v253_v20  ;;  %v257_v24 = vld [vmem:[#allocation4 + $0x88] sm:$0xff]  ;;  %v252_v25 = vld [vmem:[#allocation4 + $0x60] sm:$0xff]  ;;  %v255_v26 = vld [vmem:[#allocation4 + $0x78] sm:$0xff] }
  0x52   : > { %2686 = vmatprep.subr.bf16.mxu1 %v2685_v18  ;;  %v2689_v27 = vpack.c.bf16 %v257_v24, %v254_v22  ;;  %v259_v28 = vld [vmem:[#allocation4 + $0x98] sm:$0xff]  ;;  %v262_v29 = vld [vmem:[#allocation4 + $0xb0] sm:$0xff]  ;;  %v260_v30 = vld [vmem:[#allocation4 + $0xa0] sm:$0xff]  ;;  %v2675_v32 = vpack.c.bf16 %v255_v26, %v252_v25 }
  0x53   : > { %v263_v31 = vld [vmem:[#allocation4 + $0xb8] sm:$0xff]  ;;  %v2677_v34 = vpack.c.bf16 %v262_v29, %v259_v28  ;;  %v258_v35 = vld [vmem:[#allocation4 + $0x90] sm:$0xff]  ;;  %v261_v36 = vld [vmem:[#allocation4 + $0xa8] sm:$0xff] }
  0x54   : > { %2672 = vmatpush1.bf16.msra.mxu0 %v2671_v19  ;;  %v238_v33 = vld [vmem:[%s3426_s25] sm:$0xff]  ;;  %v2693_v37 = vpack.c.bf16 %v263_v31, %v260_v30  ;;  %v443_v38 = vld [vmem:[#allocation6 + $0x8] sm:$0xff]  ;;  %v2679_v40 = vpack.c.bf16 %v261_v36, %v258_v35  ;;  %v444_v44 = vld [vmem:[#allocation6 + $0x10] sm:$0xff] }
  0x55   : > { %2688 = vmatpush3.bf16.msra.mxu1 %v2685_v18  ;;  %2674 = vmatprep.subr.bf16.mxu0 %v2673_v23  ;;  %v446_v39 = vld [vmem:[#allocation6 + $0x20] sm:$0xff]  ;;  %v445_v43 = vld [vmem:[#allocation6 + $0x18] sm:$0xff]  ;;  %v447_v45 = vld [vmem:[#allocation6 + $0x28] sm:$0xff] }
  0x56   : > { %2690 = vmatprep.subr.bf16.mxu1 %v2689_v27  ;;  %2446 = vmatprep.mubr.msk.f32.mxu1 %vm281_vm1, %v238_v33  ;;  %v3438_v41 = vpack.c.bf16 %v446_v39, %v443_v38  ;;  %v442_v42 = vld [vmem:[#allocation6] sm:$0xff]  ;;  %v449_v46 = vld [vmem:[#allocation6 + $0x38] sm:$0xff]  ;;  %v452_v47 = vld [vmem:[#allocation6 + $0x50] sm:$0xff]  ;;  %v3444_v50 = vpack.c.bf16 %v447_v45, %v444_v44 }
  0x57   : > { %v239_v48 = vld [vmem:[%s3426_s25 + $0x8] sm:$0xff]  ;;  %v3441_v49 = vpack.c.bf16 %v445_v43, %v442_v42  ;;  %v3446_v51 = vpack.c.bf16 %v452_v47, %v449_v46  ;;  %v448_v52 = vld [vmem:[#allocation6 + $0x30] sm:$0xff]  ;;  %v453_v56 = vld [vmem:[#allocation6 + $0x58] sm:$0xff] }
  0x58   : > { %2676 = vmatpush1.bf16.msra.mxu0 %v2675_v32  ;;  %v451_v53 = vld [vmem:[#allocation6 + $0x48] sm:$0xff]  ;;  %v450_v54 = vld [vmem:[#allocation6 + $0x40] sm:$0xff]  ;;  %v457_v63 = vld [vmem:[#allocation6 + $0x78] sm:$0xff] }
  0x59   : > { %2692 = vmatpush3.bf16.msra.mxu1 %v2689_v27  ;;  %2678 = vmatprep.subr.bf16.mxu0 %v2677_v34  ;;  %v455_v57 = vld [vmem:[#allocation6 + $0x68] sm:$0xff]  ;;  %v458_v58 = vld [vmem:[#allocation6 + $0x80] sm:$0xff]  ;;  %v3452_v59 = vpack.c.bf16 %v451_v53, %v448_v52  ;;  %v3456_v60 = vpack.c.bf16 %v453_v56, %v450_v54  ;;  %v456_v0 = vld [vmem:[#allocation6 + $0x70] sm:$0xff]  ;;  %v266_v34 = vlaneseq }
  0x5a   : > { %2694 = vmatprep.subr.bf16.mxu1 %v2693_v37  ;;  %v3458_v61 = vpack.c.bf16 %v458_v58, %v455_v57  ;;  %v454_v62 = vld [vmem:[#allocation6 + $0x60] sm:$0xff]  ;;  %v459_v1 = vld [vmem:[#allocation6 + $0x88] sm:$0xff]  ;;  %v461_v2 = vld [vmem:[#allocation6 + $0x98] sm:$0xff] }
  0x5b   : > { %v464_v3 = vld [vmem:[#allocation6 + $0xb0] sm:$0xff]  ;;  %v441_v4 = vld [vmem:[#allocation3] sm:$0x3]  ;;  %v3466_v5 = vpack.c.bf16 %v457_v63, %v454_v62  ;;  %v3471_v6 = vpack.c.bf16 %v459_v1, %v456_v0  ;;  %v463_v10 = vld [vmem:[#allocation6 + $0xa8] sm:$0xff]  ;;  %v267_v35 = vshrl.u32 %v266_v34, 7 }
  0x5c   : > { %2680 = vmatpush1.bf16.msra.mxu0 %v2679_v40  ;;  %v3473_v7 = vpack.c.bf16 %v464_v3, %v461_v2  ;;  %v460_v9 = vld [vmem:[#allocation6 + $0x90] sm:$0xff]  ;;  %v462_v11 = vld [vmem:[#allocation6 + $0xa0] sm:$0xff]  ;;  %v465_v12 = vld [vmem:[#allocation6 + $0xb8] sm:$0xff]  ;;  %647 = vrot.lane.b32.xlu1 %v441_v4, %s3311_s16 }
  0x5d   : > { %2696 = vmatpush3.bf16.msra.mxu1 %v2693_v37  ;;  %2698 = vmatprep.subr.bf16.mxu0 %v3438_v41  ;;  %v467_v13 = vld [vmem:[#allocation6 + $0xc8] sm:$0xff]  ;;  %v470_v14 = vld [vmem:[#allocation6 + $0xe0] sm:$0xff]  ;;  %v3478_v15 = vpack.c.bf16 %v463_v10, %v460_v9  ;;  %v3482_v16 = vpack.c.bf16 %v465_v12, %v462_v11  ;;  %v469_v19 = vld [vmem:[#allocation6 + $0xd8] sm:$0xff]  ;;  %v276_v36 = vsub.s32 2, %v267_v35  ;;  %v268_v39 = vsub.s32 0, %v267_v35 }
  0x5e   : > { %2721 = vmatprep.subr.bf16.mxu1 %v3309_v55  ;;  %v3484_v17 = vpack.c.bf16 %v470_v14, %v467_v13  ;;  %v466_v18 = vld [vmem:[#allocation6 + $0xc0] sm:$0xff]  ;;  %v468_v20 = vld [vmem:[#allocation6 + $0xd0] sm:$0xff]  ;;  %v471_v21 = vld [vmem:[#allocation6 + $0xe8] sm:$0xff]  ;;  %v272_v42 = vsub.s32 1, %v267_v35 }
  0x5f   : > { %2294 = vmatmul.mubr.msk.f32.vlgmr.msra.gmra.mrb[0].mxu0 %vm281_vm1, %v238_v33  ;;  %v473_v22 = vld [vmem:[#allocation6 + $0xf8] sm:$0xff]  ;;  %v476_v23 = vld [vmem:[#allocation6 + $0x110] sm:$0xff]  ;;  %v3488_v24 = vpack.c.bf16 %v469_v19, %v466_v18  ;;  %v3492_v25 = vpack.c.bf16 %v471_v21, %v468_v20  ;;  %v475_v28 = vld [vmem:[#allocation6 + $0x108] sm:$0xff] }
  0x60   : > { %2447 = vmatmul.mubr.msk.f32.vlgmr.msra.gmra.mrb[0].mxu1 %vm281_vm1, %v239_v48  ;;  %2700 = vmatpush1.bf16.msra.mxu0 %v3441_v49  ;;  %v3494_v26 = vpack.c.bf16 %v476_v23, %v473_v22  ;;  %v472_v27 = vld [vmem:[#allocation6 + $0xf0] sm:$0xff]  ;;  %v474_v29 = vld [vmem:[#allocation6 + $0x100] sm:$0xff]  ;;  %v477_v30 = vld [vmem:[#allocation6 + $0x118] sm:$0xff] }
  0x61   : > { %2723 = vmatpush3.bf16.msra.mxu1 %v3444_v50  ;;  %2702 = vmatprep.subr.bf16.mxu0 %v3446_v51  ;;  %v3498_v31 = vpack.c.bf16 %v475_v28, %v472_v27  ;;  %v3502_v32 = vpack.c.bf16 %v477_v30, %v474_v29  ;;  %v440_v33 = vld [vmem:[#allocation2] sm:$0x3] }
  0x62   : > { %2724 = vmatprep.subr.bf16.mxu1 %v3309_v55  ;;  %358 = vmatprep.mubr.f32.mxu0 %v3308_v8  ;;  %v264_v37 = vld [vmem:[%s3908_s3] sm:$0x7] }
  0x63   : > { %2295 = vmatmul.mubr.msk.f32.gmra.mrb[2].mxu0 %vm281_vm1, %v239_v48  ;;  %2473 = vmatprep.mubr.msk.f32.mxu1 %vm3310_vm2, %v3308_v8  ;;  %v277_v38 = vrot.slane %v264_v37, %v276_v36  ;;  %v269_v47 = vrot.slane %v264_v37, %v268_v39  ;;  %v273_v48 = vrot.slane %v264_v37, %v272_v42 }
  0x64   : > { %2704 = vmatpush1.bf16.msra.mxu0 %v3452_v59  ;;  %546 = vmatprep.mubr.f32.mxu0 %v3308_v8 }
  0x65   : > { %2726 = vmatpush3.bf16.msra.mxu1 %v3456_v60  ;;  %2706 = vmatprep.subr.bf16.mxu0 %v3458_v61 }
  0x66   : > { %2727 = vmatprep.subr.bf16.mxu1 %v3309_v55 }
  0x68   : > { %2708 = vmatpush1.bf16.msra.mxu0 %v3466_v5 }
  0x69   : > { %2729 = vmatpush3.bf16.msra.mxu1 %v3471_v6  ;;  %2710 = vmatprep.subr.bf16.mxu0 %v3473_v7 }
  0x6a   : > { %2730 = vmatprep.subr.bf16.mxu1 %v3309_v55 }
  0x6c   : > { %2712 = vmatpush1.bf16.msra.mxu0 %v3478_v15 }
  0x6d   : > { %2732 = vmatpush3.bf16.msra.mxu1 %v3482_v16  ;;  %2714 = vmatprep.subr.bf16.mxu0 %v3484_v17 }
  0x6e   : > { %2733 = vmatprep.subr.bf16.mxu1 %v3309_v55 }
  0x70   : > { %2716 = vmatpush1.bf16.msra.mxu0 %v3488_v24 }
  0x71   : > { %2735 = vmatpush3.bf16.msra.mxu1 %v3492_v25  ;;  %2718 = vmatprep.subr.bf16.mxu0 %v3494_v26 }
  0x72   : > { %2736 = vmatprep.subr.bf16.mxu1 %v3309_v55 }
  0x74   : > { %2720 = vmatpush1.bf16.msra.mxu0 %v3498_v31 }
  0x75   : > { %2738 = vmatpush3.bf16.msra.mxu1 %v3502_v32  ;;  %2740 = vmatprep.subr.bf16.mxu0 %v3438_v41 }
  0x76   : > { %2763 = vmatprep.subr.bf16.mxu1 %v3309_v55 }
  0x77   : > { %2298 = vmatmul.mubr.msk.f32.vlgmr.msra.gmra.mrb[4].mxu0 %vm478_vm3, %v440_v33 }
  0x78   : > { %2474 = vmatmul.mubr.msk.f32.vlgmr.msra.gmra.mrb[2].mxu1 %vm478_vm3, %v440_v33  ;;  %2742 = vmatpush1.bf16.msra.mxu0 %v3441_v49 }
  0x79   : > { %2765 = vmatpush3.bf16.msra.mxu1 %v3444_v50  ;;  %2744 = vmatprep.subr.bf16.mxu0 %v3446_v51 }
  0x7a   : > { %2766 = vmatprep.subr.bf16.mxu1 %v3309_v55  ;;  %750 = vmatprep.mubr.f32.mxu0 %v3308_v8 }
  0x7b   : > { %2500 = vmatprep.mubr.msk.f32.mxu1 %vm3310_vm2, %v3308_v8 }
  0x7c   : > { %2746 = vmatpush1.bf16.msra.mxu0 %v3452_v59 }
  0x7d   : > { %2768 = vmatpush3.bf16.msra.mxu1 %v3456_v60  ;;  %2748 = vmatprep.subr.bf16.mxu0 %v3458_v61 }
  0x7e   : > { %2769 = vmatprep.subr.bf16.mxu1 %v3309_v55 }
  0x80   : > { %2750 = vmatpush1.bf16.msra.mxu0 %v3466_v5 }
  0x81   : > { %2771 = vmatpush3.bf16.msra.mxu1 %v3471_v6  ;;  %2752 = vmatprep.subr.bf16.mxu0 %v3473_v7 }
  0x82   : > { %2772 = vmatprep.subr.bf16.mxu1 %v3309_v55 }
  0x84   : > { %2754 = vmatpush1.bf16.msra.mxu0 %v3478_v15 }
  0x85   : > { %2774 = vmatpush3.bf16.msra.mxu1 %v3482_v16  ;;  %2756 = vmatprep.subr.bf16.mxu0 %v3484_v17 }
  0x86   : > { %2775 = vmatprep.subr.bf16.mxu1 %v3309_v55 }
  0x88   : > { %2758 = vmatpush1.bf16.msra.mxu0 %v3488_v24 }
  0x89   : > { %2777 = vmatpush3.bf16.msra.mxu1 %v3492_v25  ;;  %2760 = vmatprep.subr.bf16.mxu0 %v3494_v26 }
  0x8a   : > { %2778 = vmatprep.subr.bf16.mxu1 %v3309_v55 }
  0x8c   : > { %2762 = vmatpush1.bf16.msra.mxu0 %v3498_v31 }
  0x8d   : > { %2780 = vmatpush3.bf16.msra.mxu1 %v3502_v32  ;;  %2782 = vmatprep.subr.bf16.mxu0 %v3438_v41 }
  0x8e   : > { %2805 = vmatprep.subr.bf16.mxu1 %v3309_v55 }
  0xce   : > { %v648_v34 = vpop.permute.xlu1 %647 }
 0x132   : > { %v354_v40 = vpop.f32.mrb[0].mxu0 }
 0x133   : > { %v356_v43 = vpop.f32.mrb[1].mxu0  ;;  %v2448_v44 = vpop.f32.mrb[0].mxu1  ;;  %v3555_v10 = vadd.f32 %v354_v40, %v269_v47 }
 0x134   : > { %v3541_v45 = vadd.f32 %v2448_v44, %v277_v38  ;;  %v431_v46 = vpop.f32.mrb[1].mxu1  ;;  %v3547_v57 = vadd.f32 %v356_v43, %v273_v48 }
 0x135   : > { %v3550_v2 = vadd.f32 %v431_v46, %v277_v38 }
 0x136   : > { %v360_v52 = vpop.f32.mrb[2].mxu0 }
 0x137   : > { %v3543_v53 = vadd.f32 %v360_v52, %v269_v47  ;;  %v362_v54 = vpop.f32.mrb[3].mxu0 }
 0x138   : > { %v3545_v56 = vadd.f32 %v362_v54, %v273_v48 }
 0x14a   : > { %v548_v58 = vpop.f32.mrb[4].mxu0 }
 0x14b   : > { %v619_v62 = vpop.f32.mrb[2].mxu1  ;;  %v550_v63 = vpop.f32.mrb[5].mxu0  ;;  %v623_v11 = vadd.f32 %v548_v58, %v3555_v10 }
 0x14c   : > { %v624_v0 = vadd.f32 %v550_v63, %v3547_v57  ;;  %v2475_v1 = vpop.f32.mrb[3].mxu1  ;;  %v625_v3 = vadd.f32 %v619_v62, %v3550_v2 }
 0x14d   : > { %v626_v12 = vsub.f32 0.0, %v623_v11 }
 0x14e   : > { %3071 = vtanh.f32 %v624_v0  ;;  %v632_v27 = vsub.f32 0.0, %v624_v0  ;;  %v640_v43 = vsub.f32 0.0, %v625_v3 }
 0x14f   : > { %3073 = vtanh.f32 %v625_v3  ;;  %v627_v13 = vmul.f32 1.442695, %v626_v12 }
 0x150   : > { %v633_v28 = vmul.f32 1.442695, %v632_v27  ;;  %v641_v44 = vmul.f32 1.442695, %v640_v43 }
 0x151   : > { %3075 = vpow2.f32 %v627_v13 }
 0x158   : > { %v3072_v4 = vpop.eup %3071 }
 0x159   : > { %654 = vrot.lane.b32.xlu0 %v3072_v4, %s3312_s5  ;;  %v3074_v9 = vpop.eup %3073 }
 0x15b   : > { %v3076_v14 = vpop.eup %3075 }
 0x15c   : > { %v629_v18 = vadd.f32 1.0, %v3076_v14 }
 0x15d   : > { %656 = vrot.lane.b32.xlu0 %v3074_v9, %s3312_s5 }
 0x15e   : > { %3077 = vrcp.f32 %v629_v18 }
 0x15f   : > { %3079 = vpow2.f32 %v633_v28 }
 0x168   : > { %v3078_v21 = vpop.eup %3077 }
 0x169   : > { %v3080_v29 = vpop.eup %3079  ;;  %v650_v35 = vmul.f32 %v3078_v21, %v648_v34 }
 0x16a   : > { %v635_v30 = vadd.f32 1.0, %v3080_v29 }
 0x16c   : > { %3081 = vrcp.f32 %v635_v30 }
 0x176   : > { %v3082_v33 = vpop.eup %3081 }
 0x177   : > { %v651_v36 = vmul.f32 %v3082_v33, %v648_v34 }
 0x1cb   : > { %v655_v19 = vpop.permute.xlu0 %654 }
 0x1cf   : > { %v657_v20 = vpop.permute.xlu0 %656 }
 0x1d0   : > { %v658_v22 = vsel %vm281_vm1, %v655_v19, %v657_v20 }
 0x1d1   : > { %v660_v23 = vmul.f32 %v3078_v21, %v658_v22 }
 0x1d3   : > { %662 = vrot.lane.b32.xlu1 %v660_v23, %s3311_s16 }
 0x245   : > { %v663_v37 = vpop.permute.xlu1 %662 }
 0x246   : > { %v3560_v38 = vadd.f32 %v663_v37, %v650_v35  ;;  %v3562_v39 = vadd.f32 %v663_v37, %v651_v36 }
 0x248   : > { %3083 = vtanh.f32 %v3560_v38  ;;  %v862_v23 = vrot.slane %v3562_v39, 6 }
 0x249   : > { %3085 = vtanh.f32 %v3562_v39  ;;  %v861_v39 = vrot.slane %v3560_v38, 6 }
 0x24a   : > { %3087 = vpow2.f32 %v641_v44 }
 0x252   : > { %v3084_v40 = vpop.eup %3083 }
 0x253   : > { %v3086_v42 = vpop.eup %3085  ;;  %671 = vrot.lane.b32.xlu0 %v3084_v40, %s3312_s5 }
 0x254   : > { %673 = vrot.lane.b32.xlu1 %v3086_v42, %s3312_s5  ;;  %v3088_v46 = vpop.eup %3087 }
 0x255   : > { %v643_v47 = vadd.f32 1.0, %v3088_v46 }
 0x257   : > { %3089 = vrcp.f32 %v643_v47 }
 0x261   : > { %v3090_v54 = vpop.eup %3089 }
 0x2c5   : > { %v672_v48 = vpop.permute.xlu0 %671 }
 0x2c6   : > { %v674_v52 = vpop.permute.xlu1 %673 }
 0x2c7   : > { %v675_v58 = vsel %vm281_vm1, %v672_v48, %v674_v52 }
 0x2c8   : > { %v677_v62 = vmul.f32 %v3090_v54, %v675_v58 }
 0x2ca   : > { %679 = vrot.lane.b32.xlu0 %v677_v62, %s3311_s16 }
 0x33c   : > { %v680_v63 = vpop.permute.xlu0 %679 }
 0x33d   : > { %683 = vst.msk [vmem:[%s3431_s28] sm:$0x3] %vm682_vm4, %v680_v63  ;;  %2300 = vmatmul.mubr.msk.f32.vlgmr.msra.gmra.mrb[6].mxu0 %vm478_vm3, %v680_v63  ;;  %2501 = vmatmul.mubr.msk.f32.vlgmr.msra.gmra.mrb[4].mxu1 %vm478_vm3, %v680_v63 }
 0x33e   : > { %2784 = vmatpush1.bf16.msra.mxu0 %v3441_v49  ;;  %2807 = vmatpush3.bf16.msra.mxu1 %v3444_v50 }
 0x33f   : > { %2786 = vmatprep.subr.bf16.mxu0 %v3446_v51  ;;  %2808 = vmatprep.subr.bf16.mxu1 %v3309_v55 }
 0x340   : > { %968 = vmatprep.mubr.f32.mxu0 %v3308_v8  ;;  %2527 = vmatprep.mubr.msk.f32.mxu1 %vm3310_vm2, %v3308_v8 }
 0x342   : > { %2788 = vmatpush1.bf16.msra.mxu0 %v3452_v59  ;;  %2810 = vmatpush3.bf16.msra.mxu1 %v3456_v60 }
 0x343   : > { %2790 = vmatprep.subr.bf16.mxu0 %v3458_v61  ;;  %2811 = vmatprep.subr.bf16.mxu1 %v3309_v55 }
 0x346   : > { %2792 = vmatpush1.bf16.msra.mxu0 %v3466_v5  ;;  %2813 = vmatpush3.bf16.msra.mxu1 %v3471_v6 }
 0x347   : > { %2794 = vmatprep.subr.bf16.mxu0 %v3473_v7  ;;  %2814 = vmatprep.subr.bf16.mxu1 %v3309_v55 }
 0x34a   : > { %2796 = vmatpush1.bf16.msra.mxu0 %v3478_v15  ;;  %2816 = vmatpush3.bf16.msra.mxu1 %v3482_v16 }
 0x34b   : > { %2798 = vmatprep.subr.bf16.mxu0 %v3484_v17  ;;  %2817 = vmatprep.subr.bf16.mxu1 %v3309_v55 }
 0x34e   : > { %2800 = vmatpush1.bf16.msra.mxu0 %v3488_v24  ;;  %2819 = vmatpush3.bf16.msra.mxu1 %v3492_v25 }
 0x34f   : > { %2802 = vmatprep.subr.bf16.mxu0 %v3494_v26  ;;  %2820 = vmatprep.subr.bf16.mxu1 %v3309_v55 }
 0x352   : > { %2804 = vmatpush1.bf16.msra.mxu0 %v3498_v31  ;;  %2822 = vmatpush3.bf16.msra.mxu1 %v3502_v32 }
 0x353   : > { %2824 = vmatprep.subr.bf16.mxu0 %v3438_v41  ;;  %2847 = vmatprep.subr.bf16.mxu1 %v3309_v55 }
 0x410   : > { %v752_v0 = vpop.f32.mrb[6].mxu0  ;;  %v823_v1 = vpop.f32.mrb[4].mxu1 }
 0x411   : > { %v832_v3 = vrot.slane %v823_v1, 6  ;;  %v754_v4 = vpop.f32.mrb[7].mxu0  ;;  %v2502_v9 = vpop.f32.mrb[5].mxu1  ;;  %v830_v29 = vrot.slane %v752_v0, 6 }
 0x412   : > { %v831_v11 = vrot.slane %v754_v4, 6 }
 0x413   : > { %v838_v12 = vadd.f32 %v832_v3, %v3550_v2  ;;  %v836_v30 = vadd.f32 %v830_v29, %v3555_v10 }
 0x414   : > { %v837_v13 = vadd.f32 %v831_v11, %v3547_v57 }
 0x415   : > { %3091 = vtanh.f32 %v838_v12  ;;  %v839_v33 = vsub.f32 0.0, %v836_v30  ;;  %v853_v62 = vsub.f32 0.0, %v838_v12 }
 0x416   : > { %v845_v14 = vsub.f32 0.0, %v837_v13  ;;  %3093 = vtanh.f32 %v837_v13 }
 0x417   : > { %v840_v34 = vmul.f32 1.442695, %v839_v33  ;;  %v854_v63 = vmul.f32 1.442695, %v853_v62 }
 0x418   : > { %v846_v18 = vmul.f32 1.442695, %v845_v14 }
 0x41a   : > { %3095 = vpow2.f32 %v846_v18 }
 0x41f   : > { %v3092_v19 = vpop.eup %3091 }
 0x420   : > { %v3094_v20 = vpop.eup %3093  ;;  %871 = vrot.lane.b32.xlu0 %v3092_v19, %s3312_s5 }
 0x421   : > { %869 = vrot.lane.b32.xlu1 %v3094_v20, %s3312_s5 }
 0x424   : > { %v3096_v21 = vpop.eup %3095 }
 0x425   : > { %v848_v22 = vadd.f32 1.0, %v3096_v21 }
 0x427   : > { %3097 = vrcp.f32 %v848_v22 }
 0x428   : > { %3099 = vpow2.f32 %v840_v34 }
 0x431   : > { %v3098_v27 = vpop.eup %3097 }
 0x432   : > { %v866_v28 = vmul.f32 %v3098_v27, %v862_v23  ;;  %v3100_v35 = vpop.eup %3099 }
 0x433   : > { %v842_v36 = vadd.f32 1.0, %v3100_v35 }
 0x435   : > { %3101 = vrcp.f32 %v842_v36 }
 0x43f   : > { %v3102_v42 = vpop.eup %3101 }
 0x440   : > { %v865_v46 = vmul.f32 %v3102_v42, %v861_v39 }
 0x492   : > { %v872_v37 = vpop.permute.xlu0 %871 }
 0x493   : > { %v870_v40 = vpop.permute.xlu1 %869 }
 0x494   : > { %v873_v43 = vsel %vm281_vm1, %v870_v40, %v872_v37 }
 0x495   : > { %v875_v44 = vmul.f32 %v3102_v42, %v873_v43 }
 0x497   : > { %877 = vrot.lane.b32.xlu1 %v875_v44, %s3311_s16 }
 0x509   : > { %v878_v47 = vpop.permute.xlu1 %877 }
 0x50a   : > { %v3610_v48 = vadd.f32 %v878_v47, %v865_v46  ;;  %v3612_v52 = vadd.f32 %v878_v47, %v866_v28 }
 0x50c   : > { %3103 = vtanh.f32 %v3610_v48  ;;  %v1080_v36 = vrot.slane %v3612_v52, 6 }
 0x50d   : > { %3105 = vtanh.f32 %v3612_v52  ;;  %v1079_v52 = vrot.slane %v3610_v48, 6 }
 0x50e   : > { %3107 = vpow2.f32 %v854_v63 }
 0x516   : > { %v3104_v54 = vpop.eup %3103 }
 0x517   : > { %v3106_v58 = vpop.eup %3105  ;;  %886 = vrot.lane.b32.xlu0 %v3104_v54, %s3312_s5 }
 0x518   : > { %888 = vrot.lane.b32.xlu1 %v3106_v58, %s3312_s5  ;;  %v3108_v38 = vpop.eup %3107 }
 0x519   : > { %v856_v0 = vadd.f32 1.0, %v3108_v38 }
 0x51b   : > { %3109 = vrcp.f32 %v856_v0 }
 0x525   : > { %v3110_v4 = vpop.eup %3109 }
 0x589   : > { %v887_v1 = vpop.permute.xlu0 %886 }
 0x58a   : > { %v889_v3 = vpop.permute.xlu1 %888 }
 0x58b   : > { %v890_v9 = vsel %vm281_vm1, %v887_v1, %v889_v3 }
 0x58c   : > { %v3619_v11 = vmul.f32 %v3110_v4, %v890_v9 }
 0x58e   : > { %v899_v13 = vrot.slane %v3619_v11, 2 }
 0x590   : > { %900 = vrot.lane.b32.xlu0 %v899_v13, %s3311_s16 }
 0x602   : > { %v901_v14 = vpop.permute.xlu0 %900 }
 0x603   : > { %2302 = vmatmul.mubr.msk.f32.vlgmr.msra.gmra.mrb[8].mxu0 %vm478_vm3, %v901_v14  ;;  %2528 = vmatmul.mubr.msk.f32.vlgmr.msra.gmra.mrb[6].mxu1 %vm478_vm3, %v901_v14 }
 0x604   : > { %2826 = vmatpush1.bf16.msra.mxu0 %v3441_v49  ;;  %2849 = vmatpush3.bf16.msra.mxu1 %v3444_v50 }
 0x605   : > { %2828 = vmatprep.subr.bf16.mxu0 %v3446_v51  ;;  %2850 = vmatprep.subr.bf16.mxu1 %v3309_v55 }
 0x606   : > { %1186 = vmatprep.mubr.f32.mxu0 %v3308_v8  ;;  %2554 = vmatprep.mubr.msk.f32.mxu1 %vm3310_vm2, %v3308_v8 }
 0x608   : > { %2830 = vmatpush1.bf16.msra.mxu0 %v3452_v59  ;;  %2852 = vmatpush3.bf16.msra.mxu1 %v3456_v60 }
 0x609   : > { %2832 = vmatprep.subr.bf16.mxu0 %v3458_v61  ;;  %2853 = vmatprep.subr.bf16.mxu1 %v3309_v55 }
 0x60c   : > { %2834 = vmatpush1.bf16.msra.mxu0 %v3466_v5  ;;  %2855 = vmatpush3.bf16.msra.mxu1 %v3471_v6 }
 0x60d   : > { %2836 = vmatprep.subr.bf16.mxu0 %v3473_v7  ;;  %2856 = vmatprep.subr.bf16.mxu1 %v3309_v55 }
 0x610   : > { %2838 = vmatpush1.bf16.msra.mxu0 %v3478_v15  ;;  %2858 = vmatpush3.bf16.msra.mxu1 %v3482_v16 }
 0x611   : > { %2840 = vmatprep.subr.bf16.mxu0 %v3484_v17  ;;  %2859 = vmatprep.subr.bf16.mxu1 %v3309_v55 }
 0x614   : > { %2842 = vmatpush1.bf16.msra.mxu0 %v3488_v24  ;;  %2861 = vmatpush3.bf16.msra.mxu1 %v3492_v25 }
 0x615   : > { %2844 = vmatprep.subr.bf16.mxu0 %v3494_v26  ;;  %2862 = vmatprep.subr.bf16.mxu1 %v3309_v55 }
 0x618   : > { %2846 = vmatpush1.bf16.msra.mxu0 %v3498_v31  ;;  %2864 = vmatpush3.bf16.msra.mxu1 %v3502_v32 }
 0x619   : > { %2866 = vmatprep.subr.bf16.mxu0 %v3438_v41  ;;  %2889 = vmatprep.subr.bf16.mxu1 %v3309_v55 }
 0x6d6   : > { %v970_v12 = vpop.f32.mrb[8].mxu0  ;;  %v1041_v18 = vpop.f32.mrb[6].mxu1 }
 0x6d7   : > { %v1050_v19 = vrot.slane %v1041_v18, 4  ;;  %v972_v20 = vpop.f32.mrb[9].mxu0  ;;  %v2529_v21 = vpop.f32.mrb[7].mxu1  ;;  %v1048_v42 = vrot.slane %v970_v12, 4 }
 0x6d8   : > { %v1049_v22 = vrot.slane %v972_v20, 4 }
 0x6d9   : > { %v1056_v23 = vadd.f32 %v1050_v19, %v3550_v2  ;;  %v1054_v43 = vadd.f32 %v1048_v42, %v3555_v10 }
 0x6da   : > { %v1055_v27 = vadd.f32 %v1049_v22, %v3547_v57 }
 0x6db   : > { %3111 = vtanh.f32 %v1056_v23  ;;  %v1057_v44 = vsub.f32 0.0, %v1054_v43  ;;  %v1071_v14 = vsub.f32 0.0, %v1056_v23 }
 0x6dc   : > { %v1063_v28 = vsub.f32 0.0, %v1055_v27  ;;  %3113 = vtanh.f32 %v1055_v27 }
 0x6dd   : > { %v1058_v39 = vmul.f32 1.442695, %v1057_v44  ;;  %v1072_v12 = vmul.f32 1.442695, %v1071_v14 }
 0x6de   : > { %v1064_v29 = vmul.f32 1.442695, %v1063_v28 }
 0x6e0   : > { %3115 = vpow2.f32 %v1064_v29 }
 0x6e5   : > { %v3112_v30 = vpop.eup %3111 }
 0x6e6   : > { %v3114_v33 = vpop.eup %3113  ;;  %1089 = vrot.lane.b32.xlu0 %v3112_v30, %s3312_s5 }
 0x6e7   : > { %1087 = vrot.lane.b32.xlu1 %v3114_v33, %s3312_s5 }
 0x6ea   : > { %v3116_v34 = vpop.eup %3115 }
 0x6eb   : > { %v1066_v35 = vadd.f32 1.0, %v3116_v34 }
 0x6ed   : > { %3117 = vrcp.f32 %v1066_v35 }
 0x6ee   : > { %3119 = vpow2.f32 %v1058_v39 }
 0x6f7   : > { %v3118_v37 = vpop.eup %3117 }
 0x6f8   : > { %v1084_v40 = vmul.f32 %v3118_v37, %v1080_v36  ;;  %v3120_v46 = vpop.eup %3119 }
 0x6f9   : > { %v1060_v47 = vadd.f32 1.0, %v3120_v46 }
 0x6fb   : > { %3121 = vrcp.f32 %v1060_v47 }
 0x705   : > { %v3122_v62 = vpop.eup %3121 }
 0x706   : > { %v1083_v0 = vmul.f32 %v3122_v62, %v1079_v52 }
 0x758   : > { %v1090_v54 = vpop.permute.xlu0 %1089 }
 0x759   : > { %v1088_v58 = vpop.permute.xlu1 %1087 }
 0x75a   : > { %v1091_v63 = vsel %vm281_vm1, %v1088_v58, %v1090_v54 }
 0x75b   : > { %v1093_v38 = vmul.f32 %v3122_v62, %v1091_v63 }
 0x75d   : > { %1095 = vrot.lane.b32.xlu1 %v1093_v38, %s3311_s16 }
 0x7cf   : > { %v1096_v1 = vpop.permute.xlu1 %1095 }
 0x7d0   : > { %v3661_v3 = vadd.f32 %v1096_v1, %v1083_v0  ;;  %v3663_v4 = vadd.f32 %v1096_v1, %v1084_v40 }
 0x7d2   : > { %3123 = vtanh.f32 %v3661_v3  ;;  %v1298_v54 = vrot.slane %v3663_v4, 6 }
 0x7d3   : > { %3125 = vtanh.f32 %v3663_v4  ;;  %v1297_v4 = vrot.slane %v3661_v3, 6 }
 0x7d4   : > { %3127 = vpow2.f32 %v1072_v12 }
 0x7dc   : > { %v3124_v9 = vpop.eup %3123 }
 0x7dd   : > { %v3126_v13 = vpop.eup %3125  ;;  %1104 = vrot.lane.b32.xlu0 %v3124_v9, %s3312_s5 }
 0x7de   : > { %1106 = vrot.lane.b32.xlu1 %v3126_v13, %s3312_s5  ;;  %v3128_v48 = vpop.eup %3127 }
 0x7df   : > { %v1074_v18 = vadd.f32 1.0, %v3128_v48 }
 0x7e1   : > { %3129 = vrcp.f32 %v1074_v18 }
 0x7eb   : > { %v3130_v21 = vpop.eup %3129 }
 0x84f   : > { %v1105_v19 = vpop.permute.xlu0 %1104 }
 0x850   : > { %v1107_v20 = vpop.permute.xlu1 %1106 }
 0x851   : > { %v1108_v22 = vsel %vm281_vm1, %v1105_v19, %v1107_v20 }
 0x852   : > { %v3670_v27 = vmul.f32 %v3130_v21, %v1108_v22 }
 0x854   : > { %v1117_v28 = vrot.slane %v3670_v27, 4 }
 0x856   : > { %1118 = vrot.lane.b32.xlu0 %v1117_v28, %s3311_s16 }
 0x8c8   : > { %v1119_v29 = vpop.permute.xlu0 %1118 }
 0x8c9   : > { %2304 = vmatmul.mubr.msk.f32.vlgmr.msra.gmra.mrb[10].mxu0 %vm478_vm3, %v1119_v29  ;;  %2555 = vmatmul.mubr.msk.f32.vlgmr.msra.gmra.mrb[8].mxu1 %vm478_vm3, %v1119_v29 }
 0x8ca   : > { %2868 = vmatpush1.bf16.msra.mxu0 %v3441_v49  ;;  %2891 = vmatpush3.bf16.msra.mxu1 %v3444_v50 }
 0x8cb   : > { %2870 = vmatprep.subr.bf16.mxu0 %v3446_v51  ;;  %2892 = vmatprep.subr.bf16.mxu1 %v3309_v55 }
 0x8cc   : > { %1404 = vmatprep.mubr.f32.mxu0 %v3308_v8  ;;  %2581 = vmatprep.mubr.msk.f32.mxu1 %vm3310_vm2, %v3308_v8 }
 0x8ce   : > { %2872 = vmatpush1.bf16.msra.mxu0 %v3452_v59  ;;  %2894 = vmatpush3.bf16.msra.mxu1 %v3456_v60 }
 0x8cf   : > { %2874 = vmatprep.subr.bf16.mxu0 %v3458_v61  ;;  %2895 = vmatprep.subr.bf16.mxu1 %v3309_v55 }
 0x8d2   : > { %2876 = vmatpush1.bf16.msra.mxu0 %v3466_v5  ;;  %2897 = vmatpush3.bf16.msra.mxu1 %v3471_v6 }
 0x8d3   : > { %2878 = vmatprep.subr.bf16.mxu0 %v3473_v7  ;;  %2898 = vmatprep.subr.bf16.mxu1 %v3309_v55 }
 0x8d6   : > { %2880 = vmatpush1.bf16.msra.mxu0 %v3478_v15  ;;  %2900 = vmatpush3.bf16.msra.mxu1 %v3482_v16 }
 0x8d7   : > { %2882 = vmatprep.subr.bf16.mxu0 %v3484_v17  ;;  %2901 = vmatprep.subr.bf16.mxu1 %v3309_v55 }
 0x8da   : > { %2884 = vmatpush1.bf16.msra.mxu0 %v3488_v24  ;;  %2903 = vmatpush3.bf16.msra.mxu1 %v3492_v25 }
 0x8db   : > { %2886 = vmatprep.subr.bf16.mxu0 %v3494_v26  ;;  %2904 = vmatprep.subr.bf16.mxu1 %v3309_v55 }
 0x8de   : > { %2888 = vmatpush1.bf16.msra.mxu0 %v3498_v31  ;;  %2906 = vmatpush3.bf16.msra.mxu1 %v3502_v32 }
 0x8df   : > { %2908 = vmatprep.subr.bf16.mxu0 %v3438_v41  ;;  %2931 = vmatprep.subr.bf16.mxu1 %v3309_v55 }
 0x99c   : > { %v1188_v23 = vpop.f32.mrb[10].mxu0  ;;  %v1259_v30 = vpop.f32.mrb[8].mxu1 }
 0x99d   : > { %v1268_v33 = vrot.slane %v1259_v30, 2  ;;  %v1190_v34 = vpop.f32.mrb[11].mxu0  ;;  %v2556_v35 = vpop.f32.mrb[9].mxu1  ;;  %v1266_v62 = vrot.slane %v1188_v23, 2 }
 0x99e   : > { %v1267_v36 = vrot.slane %v1190_v34, 2 }
 0x99f   : > { %v1274_v37 = vadd.f32 %v1268_v33, %v3550_v2 }
 0x9a0   : > { %v1273_v40 = vadd.f32 %v1267_v36, %v3547_v57  ;;  %v1272_v57 = vadd.f32 %v1266_v62, %v3555_v10 }
 0x9a1   : > { %3131 = vtanh.f32 %v1274_v37  ;;  %v1289_v22 = vsub.f32 0.0, %v1274_v37 }
 0x9a2   : > { %v1281_v42 = vsub.f32 0.0, %v1273_v40  ;;  %3133 = vtanh.f32 %v1273_v40  ;;  %v1275_v63 = vsub.f32 0.0, %v1272_v57 }
 0x9a3   : > { %v1290_v28 = vmul.f32 1.442695, %v1289_v22 }
 0x9a4   : > { %v1282_v43 = vmul.f32 1.442695, %v1281_v42  ;;  %v1276_v38 = vmul.f32 1.442695, %v1275_v63 }
 0x9a6   : > { %3135 = vpow2.f32 %v1282_v43 }
 0x9ab   : > { %v3132_v44 = vpop.eup %3131 }
 0x9ac   : > { %v3134_v39 = vpop.eup %3133  ;;  %1307 = vrot.lane.b32.xlu0 %v3132_v44, %s3312_s5 }
 0x9ad   : > { %1305 = vrot.lane.b32.xlu1 %v3134_v39, %s3312_s5 }
 0x9b0   : > { %v3136_v46 = vpop.eup %3135 }
 0x9b1   : > { %v1284_v47 = vadd.f32 1.0, %v3136_v46 }
 0x9b3   : > { %3137 = vrcp.f32 %v1284_v47 }
 0x9b4   : > { %3139 = vpow2.f32 %v1276_v38 }
 0x9bd   : > { %v3138_v58 = vpop.eup %3137 }
 0x9be   : > { %v1302_v2 = vmul.f32 %v3138_v58, %v1298_v54  ;;  %v3140_v52 = vpop.eup %3139 }
 0x9bf   : > { %v1278_v0 = vadd.f32 1.0, %v3140_v52 }
 0x9c1   : > { %3141 = vrcp.f32 %v1278_v0 }
 0x9cb   : > { %v3142_v13 = vpop.eup %3141 }
 0x9cc   : > { %v1301_v48 = vmul.f32 %v3142_v13, %v1297_v4 }
 0xa1e   : > { %v1308_v1 = vpop.permute.xlu0 %1307 }
 0xa1f   : > { %v1306_v9 = vpop.permute.xlu1 %1305 }
 0xa20   : > { %v1309_v14 = vsel %vm281_vm1, %v1306_v9, %v1308_v1 }
 0xa21   : > { %v1311_v12 = vmul.f32 %v3142_v13, %v1309_v14 }
 0xa23   : > { %1313 = vrot.lane.b32.xlu1 %v1311_v12, %s3311_s16 }
 0xa95   : > { %v1314_v18 = vpop.permute.xlu1 %1313 }
 0xa96   : > { %v3712_v19 = vadd.f32 %v1314_v18, %v1301_v48  ;;  %v3714_v10 = vadd.f32 %v1314_v18, %v1302_v2 }
 0xa98   : > { %3143 = vtanh.f32 %v3712_v19  ;;  %v1507_v63 = vrot.slane %v3714_v10, 6 }
 0xa99   : > { %3145 = vtanh.f32 %v3714_v10  ;;  %v1506_v10 = vrot.slane %v3712_v19, 6 }
 0xa9a   : > { %3147 = vpow2.f32 %v1290_v28 }
 0xaa2   : > { %v3144_v20 = vpop.eup %3143 }
 0xaa3   : > { %v3146_v21 = vpop.eup %3145  ;;  %1322 = vrot.lane.b32.xlu0 %v3144_v20, %s3312_s5 }
 0xaa4   : > { %1324 = vrot.lane.b32.xlu1 %v3146_v21, %s3312_s5  ;;  %v3148_v3 = vpop.eup %3147 }
 0xaa5   : > { %v1292_v29 = vadd.f32 1.0, %v3148_v3 }
 0xaa7   : > { %3149 = vrcp.f32 %v1292_v29 }
 0xab1   : > { %v3150_v33 = vpop.eup %3149 }
 0xb15   : > { %v1323_v23 = vpop.permute.xlu0 %1322 }
 0xb16   : > { %v1325_v30 = vpop.permute.xlu1 %1324 }
 0xb17   : > { %v1326_v34 = vsel %vm281_vm1, %v1323_v23, %v1325_v30 }
 0xb18   : > { %v3721_v35 = vmul.f32 %v3150_v33, %v1326_v34 }
 0xb1a   : > { %v1335_v36 = vrot.slane %v3721_v35, 6 }
 0xb1c   : > { %1336 = vrot.lane.b32.xlu0 %v1335_v36, %s3311_s16 }
 0xb8e   : > { %v1337_v40 = vpop.permute.xlu0 %1336 }
 0xb8f   : > { %2306 = vmatmul.mubr.msk.f32.vlgmr.msra.gmra.mrb[12].mxu0 %vm478_vm3, %v1337_v40  ;;  %2582 = vmatmul.mubr.msk.f32.vlgmr.msra.gmra.mrb[10].mxu1 %vm478_vm3, %v1337_v40 }
 0xb90   : > { %2910 = vmatpush1.bf16.msra.mxu0 %v3441_v49  ;;  %2933 = vmatpush3.bf16.msra.mxu1 %v3444_v50 }
 0xb91   : > { %2912 = vmatprep.subr.bf16.mxu0 %v3446_v51  ;;  %2934 = vmatprep.subr.bf16.mxu1 %v3309_v55 }
 0xb92   : > { %1609 = vmatprep.mubr.f32.mxu0 %v3308_v8  ;;  %2608 = vmatprep.mubr.msk.f32.mxu1 %vm3310_vm2, %v3308_v8 }
 0xb94   : > { %2914 = vmatpush1.bf16.msra.mxu0 %v3452_v59  ;;  %2936 = vmatpush3.bf16.msra.mxu1 %v3456_v60 }
 0xb95   : > { %2916 = vmatprep.subr.bf16.mxu0 %v3458_v61  ;;  %2937 = vmatprep.subr.bf16.mxu1 %v3309_v55 }
 0xb98   : > { %2918 = vmatpush1.bf16.msra.mxu0 %v3466_v5  ;;  %2939 = vmatpush3.bf16.msra.mxu1 %v3471_v6 }
 0xb99   : > { %2920 = vmatprep.subr.bf16.mxu0 %v3473_v7  ;;  %2940 = vmatprep.subr.bf16.mxu1 %v3309_v55 }
 0xb9c   : > { %2922 = vmatpush1.bf16.msra.mxu0 %v3478_v15  ;;  %2942 = vmatpush3.bf16.msra.mxu1 %v3482_v16 }
 0xb9d   : > { %2924 = vmatprep.subr.bf16.mxu0 %v3484_v17  ;;  %2943 = vmatprep.subr.bf16.mxu1 %v3309_v55 }
 0xba0   : > { %2926 = vmatpush1.bf16.msra.mxu0 %v3488_v24  ;;  %2945 = vmatpush3.bf16.msra.mxu1 %v3492_v25 }
 0xba1   : > { %2928 = vmatprep.subr.bf16.mxu0 %v3494_v26  ;;  %2946 = vmatprep.subr.bf16.mxu1 %v3309_v55 }
 0xba4   : > { %2930 = vmatpush1.bf16.msra.mxu0 %v3498_v31  ;;  %2948 = vmatpush3.bf16.msra.mxu1 %v3502_v32 }
 0xba5   : > { %2950 = vmatprep.subr.bf16.mxu0 %v3438_v41  ;;  %2973 = vmatprep.subr.bf16.mxu1 %v3309_v55 }
 0xc62   : > { %v1406_v37 = vpop.f32.mrb[12].mxu0  ;;  %v1477_v42 = vpop.f32.mrb[10].mxu1 }
 0xc63   : > { %v1483_v43 = vadd.f32 %v1477_v42, %v3541_v45  ;;  %v1408_v44 = vpop.f32.mrb[13].mxu0  ;;  %v2583_v39 = vpop.f32.mrb[11].mxu1  ;;  %v1481_v0 = vadd.f32 %v1406_v37, %v3543_v53 }
 0xc64   : > { %v1482_v46 = vadd.f32 %v1408_v44, %v3545_v56 }
 0xc65   : > { %3151 = vtanh.f32 %v1483_v43  ;;  %v1484_v1 = vsub.f32 0.0, %v1481_v0  ;;  %v1498_v30 = vsub.f32 0.0, %v1483_v43 }
 0xc66   : > { %v1490_v47 = vsub.f32 0.0, %v1482_v46  ;;  %3153 = vtanh.f32 %v1482_v46 }
 0xc67   : > { %v1485_v9 = vmul.f32 1.442695, %v1484_v1  ;;  %v1499_v33 = vmul.f32 1.442695, %v1498_v30 }
 0xc68   : > { %v1491_v54 = vmul.f32 1.442695, %v1490_v47 }
 0xc6a   : > { %3155 = vpow2.f32 %v1491_v54 }
 0xc6f   : > { %v3152_v58 = vpop.eup %3151 }
 0xc70   : > { %v3154_v2 = vpop.eup %3153  ;;  %1516 = vrot.lane.b32.xlu0 %v3152_v58, %s3312_s5 }
 0xc71   : > { %1514 = vrot.lane.b32.xlu1 %v3154_v2, %s3312_s5 }
 0xc74   : > { %v3156_v62 = vpop.eup %3155 }
 0xc75   : > { %v1493_v57 = vadd.f32 1.0, %v3156_v62 }
 0xc77   : > { %3157 = vrcp.f32 %v1493_v57 }
 0xc78   : > { %3159 = vpow2.f32 %v1485_v9 }
 0xc81   : > { %v3158_v38 = vpop.eup %3157 }
 0xc82   : > { %v1511_v52 = vmul.f32 %v3158_v38, %v1507_v63  ;;  %v3160_v13 = vpop.eup %3159 }
 0xc83   : > { %v1487_v14 = vadd.f32 1.0, %v3160_v13 }
 0xc85   : > { %3161 = vrcp.f32 %v1487_v14 }
 0xc8f   : > { %v3162_v48 = vpop.eup %3161 }
 0xc90   : > { %v1510_v21 = vmul.f32 %v3162_v48, %v1506_v10 }
 0xce2   : > { %v1517_v12 = vpop.permute.xlu0 %1516 }
 0xce3   : > { %v1515_v4 = vpop.permute.xlu1 %1514 }
 0xce4   : > { %v1518_v18 = vsel %vm281_vm1, %v1515_v4, %v1517_v12 }
 0xce5   : > { %v1520_v20 = vmul.f32 %v3162_v48, %v1518_v18 }
 0xce7   : > { %1522 = vrot.lane.b32.xlu1 %v1520_v20, %s3311_s16 }
 0xd59   : > { %v1523_v22 = vpop.permute.xlu1 %1522 }
 0xd5a   : > { %v3763_v28 = vadd.f32 %v1523_v22, %v1510_v21  ;;  %v3765_v3 = vadd.f32 %v1523_v22, %v1511_v52 }
 0xd5c   : > { %3163 = vtanh.f32 %v3763_v28  ;;  %v1721_v9 = vrot.slane %v3765_v3, 6 }
 0xd5d   : > { %3165 = vtanh.f32 %v3765_v3  ;;  %v1720_v3 = vrot.slane %v3763_v28, 6 }
 0xd5e   : > { %3167 = vpow2.f32 %v1499_v33 }
 0xd66   : > { %v3164_v29 = vpop.eup %3163 }
 0xd67   : > { %v3166_v23 = vpop.eup %3165  ;;  %1531 = vrot.lane.b32.xlu0 %v3164_v29, %s3312_s5 }
 0xd68   : > { %1533 = vrot.lane.b32.xlu1 %v3166_v23, %s3312_s5  ;;  %v3168_v19 = vpop.eup %3167 }
 0xd69   : > { %v1501_v34 = vadd.f32 1.0, %v3168_v19 }
 0xd6b   : > { %3169 = vrcp.f32 %v1501_v34 }
 0xd75   : > { %v3170_v37 = vpop.eup %3169 }
 0xdd9   : > { %v1532_v36 = vpop.permute.xlu0 %1531 }
 0xdda   : > { %v1534_v40 = vpop.permute.xlu1 %1533 }
 0xddb   : > { %v1535_v42 = vsel %vm281_vm1, %v1532_v36, %v1534_v40 }
 0xddc   : > { %v1537_v44 = vmul.f32 %v3170_v37, %v1535_v42 }
 0xdde   : > { %1539 = vrot.lane.b32.xlu0 %v1537_v44, %s3311_s16 }
 0xe50   : > { %v1540_v39 = vpop.permute.xlu0 %1539 }
 0xe51   : > { %1542 = vst.msk [vmem:[%s3431_s28 + $0x8] sm:$0x3] %vm682_vm4, %v1540_v39  ;;  %2308 = vmatmul.mubr.msk.f32.vlgmr.msra.gmra.mrb[14].mxu0 %vm478_vm3, %v1540_v39  ;;  %2609 = vmatmul.mubr.msk.f32.vlgmr.msra.gmra.mrb[12].mxu1 %vm478_vm3, %v1540_v39 }
 0xe52   : > { %2952 = vmatpush1.bf16.msra.mxu0 %v3441_v49  ;;  %2975 = vmatpush3.bf16.msra.mxu1 %v3444_v50 }
 0xe53   : > { %2954 = vmatprep.subr.bf16.mxu0 %v3446_v51  ;;  %2976 = vmatprep.subr.bf16.mxu1 %v3309_v55 }
 0xe54   : > { %1826 = vmatprep.mubr.f32.mxu0 %v3308_v8  ;;  %2635 = vmatprep.mubr.msk.f32.mxu1 %vm3310_vm2, %v3308_v8 }
 0xe56   : > { %2956 = vmatpush1.bf16.msra.mxu0 %v3452_v59  ;;  %2978 = vmatpush3.bf16.msra.mxu1 %v3456_v60 }
 0xe57   : > { %2958 = vmatprep.subr.bf16.mxu0 %v3458_v61  ;;  %2979 = vmatprep.subr.bf16.mxu1 %v3309_v55 }
 0xe5a   : > { %2960 = vmatpush1.bf16.msra.mxu0 %v3466_v5  ;;  %2981 = vmatpush3.bf16.msra.mxu1 %v3471_v6 }
 0xe5b   : > { %2962 = vmatprep.subr.bf16.mxu0 %v3473_v7  ;;  %2982 = vmatprep.subr.bf16.mxu1 %v3309_v55 }
 0xe5e   : > { %2964 = vmatpush1.bf16.msra.mxu0 %v3478_v15  ;;  %2984 = vmatpush3.bf16.msra.mxu1 %v3482_v16 }
 0xe5f   : > { %2966 = vmatprep.subr.bf16.mxu0 %v3484_v17  ;;  %2985 = vmatprep.subr.bf16.mxu1 %v3309_v55 }
 0xe62   : > { %2968 = vmatpush1.bf16.msra.mxu0 %v3488_v24  ;;  %2987 = vmatpush3.bf16.msra.mxu1 %v3492_v25 }
 0xe63   : > { %2970 = vmatprep.subr.bf16.mxu0 %v3494_v26  ;;  %2988 = vmatprep.subr.bf16.mxu1 %v3309_v55 }
 0xe66   : > { %2972 = vmatpush1.bf16.msra.mxu0 %v3498_v31  ;;  %2990 = vmatpush3.bf16.msra.mxu1 %v3502_v32 }
 0xe67   : > { %2992 = vmatprep.subr.bf16.mxu0 %v3438_v41  ;;  %3015 = vmatprep.subr.bf16.mxu1 %v3309_v55 }
 0xf24   : > { %v1611_v43 = vpop.f32.mrb[14].mxu0  ;;  %v1682_v46 = vpop.f32.mrb[12].mxu1 }
 0xf25   : > { %v1691_v47 = vrot.slane %v1682_v46, 6  ;;  %v1613_v54 = vpop.f32.mrb[15].mxu0  ;;  %v2610_v58 = vpop.f32.mrb[13].mxu1  ;;  %v1689_v12 = vrot.slane %v1611_v43, 6 }
 0xf26   : > { %v1690_v2 = vrot.slane %v1613_v54, 6 }
 0xf27   : > { %v1697_v62 = vadd.f32 %v1691_v47, %v3541_v45  ;;  %v1695_v4 = vadd.f32 %v1689_v12, %v3543_v53 }
 0xf28   : > { %v1696_v57 = vadd.f32 %v1690_v2, %v3545_v56 }
 0xf29   : > { %3171 = vtanh.f32 %v1697_v62  ;;  %v1698_v48 = vsub.f32 0.0, %v1695_v4  ;;  %v1712_v42 = vsub.f32 0.0, %v1697_v62 }
 0xf2a   : > { %v1704_v63 = vsub.f32 0.0, %v1696_v57  ;;  %3173 = vtanh.f32 %v1696_v57 }
 0xf2b   : > { %v1699_v18 = vmul.f32 1.442695, %v1698_v48  ;;  %v1713_v44 = vmul.f32 1.442695, %v1712_v42 }
 0xf2c   : > { %v1705_v38 = vmul.f32 1.442695, %v1704_v63 }
 0xf2e   : > { %3175 = vpow2.f32 %v1705_v38 }
 0xf33   : > { %v3172_v52 = vpop.eup %3171 }
 0xf34   : > { %v3174_v0 = vpop.eup %3173  ;;  %1730 = vrot.lane.b32.xlu0 %v3172_v52, %s3312_s5 }
 0xf35   : > { %1728 = vrot.lane.b32.xlu1 %v3174_v0, %s3312_s5 }
 0xf38   : > { %v3176_v41 = vpop.eup %3175 }
 0xf39   : > { %v1707_v1 = vadd.f32 1.0, %v3176_v41 }
 0xf3b   : > { %3177 = vrcp.f32 %v1707_v1 }
 0xf3c   : > { %3179 = vpow2.f32 %v1699_v18 }
 0xf45   : > { %v3178_v13 = vpop.eup %3177 }
 0xf46   : > { %v1725_v14 = vmul.f32 %v3178_v13, %v1721_v9  ;;  %v3180_v20 = vpop.eup %3179 }
 0xf47   : > { %v1701_v10 = vadd.f32 1.0, %v3180_v20 }
 0xf49   : > { %3181 = vrcp.f32 %v1701_v10 }
 0xf53   : > { %v3182_v29 = vpop.eup %3181 }
 0xf54   : > { %v1724_v33 = vmul.f32 %v3182_v29, %v1720_v3 }
 0xfa6   : > { %v1731_v21 = vpop.permute.xlu0 %1730 }
 0xfa7   : > { %v1729_v22 = vpop.permute.xlu1 %1728 }
 0xfa8   : > { %v1732_v23 = vsel %vm281_vm1, %v1729_v22, %v1731_v21 }
 0xfa9   : > { %v1734_v30 = vmul.f32 %v3182_v29, %v1732_v23 }
 0xfab   : > { %1736 = vrot.lane.b32.xlu1 %v1734_v30, %s3311_s16 }
0x101d   : > { %v1737_v19 = vpop.permute.xlu1 %1736 }
0x101e   : > { %v3813_v34 = vadd.f32 %v1737_v19, %v1724_v33  ;;  %v3815_v36 = vadd.f32 %v1737_v19, %v1725_v14 }
0x1020   : > { %3183 = vtanh.f32 %v3813_v34  ;;  %v1937_v14 = vrot.slane %v3813_v34, 6 }
0x1021   : > { %3185 = vtanh.f32 %v3815_v36 }
0x1022   : > { %3187 = vpow2.f32 %v1713_v44 }
0x102a   : > { %v3184_v40 = vpop.eup %3183 }
0x102b   : > { %v3186_v37 = vpop.eup %3185  ;;  %1745 = vrot.lane.b32.xlu0 %v3184_v40, %s3312_s5 }
0x102c   : > { %1747 = vrot.lane.b32.xlu1 %v3186_v37, %s3312_s5  ;;  %v3188_v28 = vpop.eup %3187 }
0x102d   : > { %v1715_v39 = vadd.f32 1.0, %v3188_v28 }
0x102f   : > { %3189 = vrcp.f32 %v1715_v39 }
0x1039   : > { %v3190_v47 = vpop.eup %3189 }
0x109d   : > { %v1746_v43 = vpop.permute.xlu0 %1745 }
0x109e   : > { %v1748_v46 = vpop.permute.xlu1 %1747 }
0x109f   : > { %v1749_v54 = vsel %vm281_vm1, %v1746_v43, %v1748_v46 }
0x10a0   : > { %v3822_v58 = vmul.f32 %v3190_v47, %v1749_v54 }
0x10a2   : > { %v1757_v2 = vrot.slane %v3822_v58, 2 }
0x10a4   : > { %1758 = vrot.lane.b32.xlu0 %v1757_v2, %s3311_s16 }
0x1116   : > { %v1759_v57 = vpop.permute.xlu0 %1758 }
0x1117   : > { %2310 = vmatmul.mubr.msk.f32.vlgmr.msra.gmra.mrb[16].mxu0 %vm478_vm3, %v1759_v57  ;;  %2636 = vmatmul.mubr.msk.f32.vlgmr.msra.gmra.mrb[14].mxu1 %vm478_vm3, %v1759_v57 }
0x1118   : > { %2994 = vmatpush1.bf16.msra.mxu0 %v3441_v49  ;;  %3017 = vmatpush3.bf16.msra.mxu1 %v3444_v50 }
0x1119   : > { %2996 = vmatprep.subr.bf16.mxu0 %v3446_v51  ;;  %3018 = vmatprep.subr.bf16.mxu1 %v3309_v55 }
0x111a   : > { %2043 = vmatprep.mubr.f32.mxu0 %v3308_v8  ;;  %2662 = vmatprep.mubr.msk.f32.mxu1 %vm3310_vm2, %v3308_v8 }
0x111c   : > { %2998 = vmatpush1.bf16.msra.mxu0 %v3452_v59  ;;  %3020 = vmatpush3.bf16.msra.mxu1 %v3456_v60 }
0x111d   : > { %3000 = vmatprep.subr.bf16.mxu0 %v3458_v61  ;;  %3021 = vmatprep.subr.bf16.mxu1 %v3309_v55 }
0x1120   : > { %3002 = vmatpush1.bf16.msra.mxu0 %v3466_v5  ;;  %3023 = vmatpush3.bf16.msra.mxu1 %v3471_v6 }
0x1121   : > { %3004 = vmatprep.subr.bf16.mxu0 %v3473_v7  ;;  %3024 = vmatprep.subr.bf16.mxu1 %v3309_v55 }
0x1124   : > { %3006 = vmatpush1.bf16.msra.mxu0 %v3478_v15  ;;  %3026 = vmatpush3.bf16.msra.mxu1 %v3482_v16 }
0x1125   : > { %3008 = vmatprep.subr.bf16.mxu0 %v3484_v17  ;;  %3027 = vmatprep.subr.bf16.mxu1 %v3309_v55 }
0x1128   : > { %3010 = vmatpush1.bf16.msra.mxu0 %v3488_v24  ;;  %3029 = vmatpush3.bf16.msra.mxu1 %v3492_v25  ;;  %v1938_v24 = vrot.slane %v3815_v36, 6 }
0x1129   : > { %3012 = vmatprep.subr.bf16.mxu0 %v3494_v26  ;;  %3030 = vmatprep.subr.bf16.mxu1 %v3309_v55 }
0x112c   : > { %3014 = vmatpush1.bf16.msra.mxu0 %v3498_v31  ;;  %3032 = vmatpush3.bf16.msra.mxu1 %v3502_v32 }
0x11ea   : > { %v1828_v8 = vpop.f32.mrb[16].mxu0  ;;  %v1899_v49 = vpop.f32.mrb[14].mxu1 }
0x11eb   : > { %v1908_v50 = vrot.slane %v1899_v49, 4  ;;  %v1830_v51 = vpop.f32.mrb[17].mxu0  ;;  %v2637_v59 = vpop.f32.mrb[15].mxu1  ;;  %v1906_v31 = vrot.slane %v1828_v8, 4 }
0x11ec   : > { %v1907_v60 = vrot.slane %v1830_v51, 4 }
0x11ed   : > { %v1914_v61 = vadd.f32 %v1908_v50, %v3541_v45  ;;  %v1912_v32 = vadd.f32 %v1906_v31, %v3543_v53 }
0x11ee   : > { %v1913_v5 = vadd.f32 %v1907_v60, %v3545_v56 }
0x11ef   : > { %3191 = vtanh.f32 %v1914_v61  ;;  %v1915_v62 = vsub.f32 0.0, %v1912_v32  ;;  %v1929_v21 = vsub.f32 0.0, %v1914_v61 }
0x11f0   : > { %v1921_v6 = vsub.f32 0.0, %v1913_v5  ;;  %3193 = vtanh.f32 %v1913_v5 }
0x11f1   : > { %v1916_v63 = vmul.f32 1.442695, %v1915_v62  ;;  %v1930_v22 = vmul.f32 1.442695, %v1929_v21 }
0x11f2   : > { %v1922_v7 = vmul.f32 1.442695, %v1921_v6 }
0x11f4   : > { %3195 = vpow2.f32 %v1922_v7 }
0x11f9   : > { %v3192_v55 = vpop.eup %3191 }
0x11fa   : > { %v3194_v15 = vpop.eup %3193  ;;  %1947 = vrot.lane.b32.xlu0 %v3192_v55, %s3312_s5 }
0x11fb   : > { %1945 = vrot.lane.b32.xlu1 %v3194_v15, %s3312_s5 }
0x11fe   : > { %v3196_v16 = vpop.eup %3195 }
0x11ff   : > { %v1924_v17 = vadd.f32 1.0, %v3196_v16 }
0x1201   : > { %3197 = vrcp.f32 %v1924_v17 }
0x1202   : > { %3199 = vpow2.f32 %v1916_v63 }
0x120b   : > { %v3198_v25 = vpop.eup %3197 }
0x120c   : > { %v1942_v26 = vmul.f32 %v3198_v25, %v1938_v24  ;;  %v3200_v38 = vpop.eup %3199 }
0x120d   : > { %v1918_v52 = vadd.f32 1.0, %v3200_v38 }
0x120f   : > { %3201 = vrcp.f32 %v1918_v52 }
0x1219   : > { %v3202_v1 = vpop.eup %3201 }
0x121a   : > { %v1941_v12 = vmul.f32 %v3202_v1, %v1937_v14 }
0x126c   : > { %v1948_v0 = vpop.permute.xlu0 %1947 }
0x126d   : > { %v1946_v41 = vpop.permute.xlu1 %1945 }
0x126e   : > { %v1949_v9 = vsel %vm281_vm1, %v1946_v41, %v1948_v0 }
0x126f   : > { %v1951_v13 = vmul.f32 %v3202_v1, %v1949_v9 }
0x1271   : > { %1953 = vrot.lane.b32.xlu1 %v1951_v13, %s3311_s16 }
0x12e3   : > { %v1954_v4 = vpop.permute.xlu1 %1953 }
0x12e4   : > { %v3862_v48 = vadd.f32 %v1954_v4, %v1941_v12  ;;  %v1957_v18 = vadd.f32 %v1954_v4, %v1942_v26 }
0x12e6   : > { %3203 = vtanh.f32 %v3862_v48  ;;  %v2155_v51 = vrot.slane %v1957_v18, 6  ;;  %v2154_v25 = vrot.slane %v3862_v48, 6 }
0x12e7   : > { %3205 = vtanh.f32 %v1957_v18 }
0x12e8   : > { %3207 = vpow2.f32 %v1930_v22 }
0x12f0   : > { %v3204_v20 = vpop.eup %3203 }
0x12f1   : > { %v3206_v10 = vpop.eup %3205  ;;  %1962 = vrot.lane.b32.xlu0 %v3204_v20, %s3312_s5 }
0x12f2   : > { %1964 = vrot.lane.b32.xlu1 %v3206_v10, %s3312_s5  ;;  %v3208_v29 = vpop.eup %3207 }
0x12f3   : > { %v1932_v23 = vadd.f32 1.0, %v3208_v29 }
0x12f5   : > { %3209 = vrcp.f32 %v1932_v23 }
0x12ff   : > { %v3210_v33 = vpop.eup %3209 }
0x1363   : > { %v1963_v30 = vpop.permute.xlu0 %1962 }
0x1364   : > { %v1965_v3 = vpop.permute.xlu1 %1964 }
0x1365   : > { %v1966_v19 = vsel %vm281_vm1, %v1963_v30, %v1965_v3 }
0x1366   : > { %v1968_v34 = vmul.f32 %v3210_v33, %v1966_v19 }
0x1368   : > { %v1974_v36 = vrot.slane %v1968_v34, 4 }
0x136a   : > { %1975 = vrot.lane.b32.xlu0 %v1974_v36, %s3311_s16 }
0x13dc   : > { %v1976_v40 = vpop.permute.xlu0 %1975 }
0x13dd   : > { %2312 = vmatmul.mubr.msk.f32.vlgmr.msra.gmra.mrb[18].mxu0 %vm478_vm3, %v1976_v40  ;;  %2663 = vmatmul.mubr.msk.f32.vlgmr.msra.gmra.mrb[16].mxu1 %vm478_vm3, %v1976_v40 }
0x14b0   : > { %v2045_v37 = vpop.f32.mrb[18].mxu0  ;;  %v2116_v42 = vpop.f32.mrb[16].mxu1 }
0x14b1   : > { %v2125_v44 = vrot.slane %v2116_v42, 2  ;;  %v2047_v28 = vpop.f32.mrb[19].mxu0  ;;  %v2664_v39 = vpop.f32.mrb[17].mxu1 }
0x14b2   : > { %v2124_v43 = vrot.slane %v2047_v28, 2 }
0x14b3   : > { %v2131_v46 = vadd.f32 %v2125_v44, %v3541_v45  ;;  %v2123_v45 = vrot.slane %v2045_v37, 2 }
0x14b4   : > { %v2130_v47 = vadd.f32 %v2124_v43, %v3545_v56 }
0x14b5   : > { %3211 = vtanh.f32 %v2131_v46  ;;  %v2129_v56 = vadd.f32 %v2123_v45, %v3543_v53  ;;  %v2146_v38 = vsub.f32 0.0, %v2131_v46 }
0x14b6   : > { %v2138_v54 = vsub.f32 0.0, %v2130_v47  ;;  %3213 = vtanh.f32 %v2130_v47 }
0x14b7   : > { %v2132_v61 = vsub.f32 0.0, %v2129_v56  ;;  %v2147_v52 = vmul.f32 1.442695, %v2146_v38 }
0x14b8   : > { %v2139_v2 = vmul.f32 1.442695, %v2138_v54 }
0x14b9   : > { %v2133_v5 = vmul.f32 1.442695, %v2132_v61 }
0x14ba   : > { %3215 = vpow2.f32 %v2139_v2 }
0x14bf   : > { %v3212_v57 = vpop.eup %3211 }
0x14c0   : > { %v3214_v8 = vpop.eup %3213  ;;  %2164 = vrot.lane.b32.xlu0 %v3212_v57, %s3312_s5 }
0x14c1   : > { %2162 = vrot.lane.b32.xlu1 %v3214_v8, %s3312_s5 }
0x14c4   : > { %v3216_v49 = vpop.eup %3215 }
0x14c5   : > { %v2141_v50 = vadd.f32 1.0, %v3216_v49 }
0x14c7   : > { %3217 = vrcp.f32 %v2141_v50 }
0x14c8   : > { %3219 = vpow2.f32 %v2133_v5 }
0x14d1   : > { %v3218_v59 = vpop.eup %3217 }
0x14d2   : > { %v2159_v60 = vmul.f32 %v3218_v59, %v2155_v51  ;;  %v3220_v6 = vpop.eup %3219 }
0x14d3   : > { %v2135_v7 = vadd.f32 1.0, %v3220_v6 }
0x14d5   : > { %3221 = vrcp.f32 %v2135_v7 }
0x14df   : > { %v3222_v16 = vpop.eup %3221 }
0x14e0   : > { %v2158_v26 = vmul.f32 %v3222_v16, %v2154_v25 }
0x1532   : > { %v2165_v55 = vpop.permute.xlu0 %2164 }
0x1533   : > { %v2163_v15 = vpop.permute.xlu1 %2162 }
0x1534   : > { %v2166_v17 = vsel %vm281_vm1, %v2163_v15, %v2165_v55 }
0x1535   : > { %v2168_v24 = vmul.f32 %v3222_v16, %v2166_v17 }
0x1537   : > { %2170 = vrot.lane.b32.xlu1 %v2168_v24, %s3311_s16 }
0x15a9   : > { %v2171_v31 = vpop.permute.xlu1 %2170 }
0x15aa   : > { %v2173_v32 = vadd.f32 %v2171_v31, %v2158_v26  ;;  %v2174_v53 = vadd.f32 %v2171_v31, %v2159_v60 }
0x15ac   : > { %3223 = vtanh.f32 %v2173_v32 }
0x15ad   : > { %3225 = vtanh.f32 %v2174_v53 }
0x15ae   : > { %3227 = vpow2.f32 %v2147_v52 }
0x15b6   : > { %v3224_v62 = vpop.eup %3223 }
0x15b7   : > { %v3226_v63 = vpop.eup %3225  ;;  %2179 = vrot.lane.b32.xlu0 %v3224_v62, %s3312_s5 }
0x15b8   : > { %2181 = vrot.lane.b32.xlu1 %v3226_v63, %s3312_s5 }
0x15bb   : > { %894 = vrot.lane.b32.xlu0 %v3619_v11, %s3311_s16  ;;  %v3228_v11 = vpop.eup %3227 }
0x15bc   : > { %1112 = vrot.lane.b32.xlu1 %v3670_v27, %s3311_s16  ;;  %v2149_v0 = vadd.f32 1.0, %v3228_v11 }
0x15be   : > { %3229 = vrcp.f32 %v2149_v0 }
0x15bf   : > { %1330 = vrot.lane.b32.xlu0 %v3721_v35, %s3311_s16 }
0x15c0   : > { %2194 = vrot.lane.b32.xlu1 %v2173_v32, %s3313_s6 }
0x15c3   : > { %2196 = vrot.lane.b32.xlu0 %v2174_v53, %s3313_s6 }
0x15c4   : > { %1753 = vrot.lane.b32.xlu1 %v3822_v58, %s3311_s16 }
0x15c7   : > { %1970 = vrot.lane.b32.xlu0 %v1968_v34, %s3311_s16 }
0x15c8   : > { %v3230_v35 = vpop.eup %3229 }
0x1629   : > { %v2180_v27 = vpop.permute.xlu0 %2179 }
0x162a   : > { %v2182_v41 = vpop.permute.xlu1 %2181 }
0x162b   : > { %v2183_v1 = vsel %vm281_vm1, %v2180_v27, %v2182_v41 }
0x162c   : > { %v2185_v9 = vmul.f32 %v3230_v35, %v2183_v1 }
0x162d   : > { %v895_v58 = vpop.permute.xlu0 %894 }
0x162e   : > { %898 = vst.msk [vmem:[%s3431_s28] sm:$0xc] %vm897_vm5, %v895_v58  ;;  %2187 = vrot.lane.b32.xlu1 %v2185_v9, %s3311_s16  ;;  %v1113_v13 = vpop.permute.xlu1 %1112 }
0x162f   : > { %1116 = vst.msk [vmem:[%s3431_s28] sm:$0x30] %vm1115_vm6, %v1113_v13 }
0x1631   : > { %v1331_v14 = vpop.permute.xlu0 %1330 }
0x1632   : > { %1334 = vst.msk [vmem:[%s3431_s28] sm:$0xc0] %vm1333_vm7, %v1331_v14  ;;  %v2195_v12 = vpop.permute.xlu1 %2194 }
0x1635   : > { %v2197_v4 = vpop.permute.xlu0 %2196 }
0x1636   : > { %v2199_v48 = vsel %vm2198_vm8, %v2195_v12, %v2197_v4  ;;  %v1754_v18 = vpop.permute.xlu1 %1753 }
0x1637   : > { %2201 = vst.msk [vmem:[#allocation3 - $0x6] sm:$0xc0] %vm1333_vm7, %v2199_v48 }
0x1638   : > { %1756 = vst.msk [vmem:[%s3431_s28 + $0x8] sm:$0xc] %vm897_vm5, %v1754_v18 }
0x1639   : > { %v1971_v20 = vpop.permute.xlu0 %1970 }
0x163a   : > { %1973 = vst.msk [vmem:[%s3431_s28 + $0x8] sm:$0x30] %vm1115_vm6, %v1971_v20 }
0x16a0   : > { %v2188_v10 = vpop.permute.xlu1 %2187 }
0x16a1   : > { %2190 = vst.msk [vmem:[%s3431_s28 + $0x8] sm:$0xc0] %vm1333_vm7, %v2188_v10  ;;  %2191 = vst.msk [vmem:[#allocation2 - $0x6] sm:$0xc0] %vm1333_vm7, %v2188_v10 }
0x16a2 PF: > { %s16_s15 = sadd.s32 1, %s3301_s15  }
0x16a3   : > { %p13_p10 = scmp.ge.s32.totalorder %s16_s15, 4  }
0x16a5   :  { %15 = sbr.rel (!%p13_p10) target bundleno = 2 (0x2), region = 79 }
0x16ac   :  { %2224 = vsyncpa [#allocation5], 1 }
0x16ad   :  { %2226 = vsyncpa [#allocation5 + $0x1], 1 }
0x16ae   :  { %2227 = vsyncpa [#allocation7], 1 }

</bundles_post_ra>
